<compile_context>
chip_gen: v5e
topology: v5e:2x2
jax: 0.10.0
libtpu: 0.0.40
codegen_flags: <defaults>
</compile_context>

<pallas_src>
import math
from functools import partial

import jax
import jax.numpy as jnp
from jax import lax
from jax.experimental import pallas as pl
from jax.experimental.pallas import tpu as pltpu


MATMUL_DTYPE = jnp.bfloat16   # MXU operand dtype; accumulation is always f32.

LAYER_KEYS = ["wqkv", "bqkv", "wo", "bo", "ln1w", "ln1b", "ln2w", "ln2b",
              "w1", "b1", "w2", "b2"]
HEAD_KEYS = ["pw1", "pb1", "pw2", "pb2", "cw", "cb"]

# Kernel-layout parameter order (matches model_kernel signature).
KERNEL_PARAM_KEYS = ["aq", "bq", "ak", "bk", "av", "bv", "ao", "bo",
                     "ln1w", "ln1b", "ln2w", "ln2b",
                     "w1", "b1", "w2", "b2",
                     "pw1", "pb1", "pw2", "pb2", "cw", "cb"]


# ----------------------------- in-kernel helpers -----------------------------

def _linear(x, w, b):
    # x: (M, in) f32 ; w: (in, out) bf16 (pre-transposed host-side) ; b: (1, out) f32
    y = jnp.dot(x.astype(w.dtype), w, preferred_element_type=jnp.float32)
    return y + b


def _layernorm(x, w, b, eps=1e-5):
    mu = jnp.mean(x, axis=-1, keepdims=True)
    var = jnp.mean((x - mu) ** 2, axis=-1, keepdims=True)
    return (x - mu) * lax.rsqrt(var + eps) * w + b


# ------------------------------ fused model kernel ----------------------------
# One grid step == one batch element (whole per-example forward fused, weights VMEM-resident).

def model_kernel(x_ref,
                 aq_ref, bq_ref, ak_ref, bk_ref, av_ref, bv_ref, ao_ref, bo_ref,
                 ln1w_ref, ln1b_ref, ln2w_ref, ln2b_ref,
                 w1_ref, b1_ref, w2_ref, b2_ref,
                 pw1_ref, pb1_ref, pw2_ref, pb2_ref, cw_ref, cb_ref,
                 o_ref, *, nhead, num_layers):
    H = nhead
    x = x_ref[...]                                   # (S, D) f32 activations for this example
    S, D = x.shape
    cd = aq_ref.dtype                                # MXU operand dtype (bf16)

    # ---------------- transformer encoder layers (static unroll, L is small) ----------------
    for l in range(num_layers):
        # --- multi-head self-attention: heads are a batched-matmul axis, no lane slicing ---
        xh = jnp.broadcast_to(x.astype(cd)[None], (H, S, D))                    # (H, S, D)
        q = jnp.einsum('hsd,hdk->hsk', xh, aq_ref[l],
                       preferred_element_type=jnp.float32) + bq_ref[l]          # (H, S, hd) scale pre-folded
        k = jnp.einsum('hsd,hdk->hsk', xh, ak_ref[l],
                       preferred_element_type=jnp.float32) + bk_ref[l]          # (H, S, hd)
        v = jnp.einsum('hsd,hdk->hsk', xh, av_ref[l],
                       preferred_element_type=jnp.float32) + bv_ref[l]          # (H, S, hd)

        s = jnp.einsum('hqc,hkc->hqk', q.astype(cd), k.astype(cd),
                       preferred_element_type=jnp.float32)                      # (H, S, S)
        s = s - jnp.max(s, axis=-1, keepdims=True)
        e = jnp.exp(s)
        p = e / jnp.sum(e, axis=-1, keepdims=True)                              # exact softmax (f32)

        ctx = jnp.einsum('hqk,hkc->hqc', p.astype(cd), v.astype(cd),
                         preferred_element_type=jnp.float32)                    # (H, S, hd)
        # Per-head output projection fused into ONE batched dot_general (weights pre-split
        # host-side to (H, hd, D)) + a cheap sublane-axis sum — no wo lane slices, no add chain.
        proj = jnp.einsum('hqc,hcd->hqd', ctx.astype(cd), ao_ref[l],
                          preferred_element_type=jnp.float32)                   # (H, S, D)
        attn = jnp.sum(proj, axis=0) + bo_ref[l]                                # (S, D)

        # post-norm residual block 1
        x1 = _layernorm(x + attn, ln1w_ref[l], ln1b_ref[l])

        # --- feedforward ---
        # TODO(synk): PyTorch 'gelu' is the exact erf GELU; tanh approximation used here
        # (guaranteed Mosaic lowering), deviation is O(1e-3).
        h1 = jax.nn.gelu(_linear(x1, w1_ref[l], b1_ref[l]), approximate=True)   # (S, F)
        ff = _linear(h1, w2_ref[l], b2_ref[l])                                  # (S, D)

        # post-norm residual block 2
        x = _layernorm(x1 + ff, ln2w_ref[l], ln2b_ref[l])

    # ---------------- attention pooling over the sequence axis + classifier ----------------
    hp = jnp.tanh(_linear(x, pw1_ref[...], pb1_ref[...]))                       # (S, 128)
    sc = _linear(hp, pw2_ref[...], pb2_ref[...])                                # (S, 1)
    sc = sc - jnp.max(sc, axis=0, keepdims=True)
    e = jnp.exp(sc)
    w = e / jnp.sum(e, axis=0, keepdims=True)                                   # softmax over seq (exact)
    pooled = jnp.sum(w * x, axis=0, keepdims=True)                              # (1, D) == bmm(w^T, x)
    logits = _linear(pooled, cw_ref[...], cb_ref[...])                          # (1, num_classes)
    o_ref[...] = logits.astype(o_ref.dtype)


# --------------------------- host-side weight preparation ---------------------------
# PyTorch-layout params -> kernel layout: (in, out) transposes, per-head reshapes,
# 1/sqrt(hd) folded into the Q projection, matmul weights cast to bf16.

def prepare_params(layers, head, nhead, matmul_dtype=MATMUL_DTYPE):
    wqkv = layers["wqkv"]                               # (L, 3D, D)  [out, in] PyTorch layout
    L, threeD, D = wqkv.shape
    H = nhead
    hd = D // H
    scale = 1.0 / math.sqrt(hd)

    bqkv = layers["bqkv"].reshape(L, threeD)
    wq, wk, wv = wqkv[:, :D], wqkv[:, D:2 * D], wqkv[:, 2 * D:]
    bq, bk, bv = bqkv[:, :D], bqkv[:, D:2 * D], bqkv[:, 2 * D:]

    def per_head_in_out(w):                             # (L, D_out, D_in) -> (L, H, D_in, hd)
        return w.reshape(L, H, hd, D).transpose(0, 1, 3, 2)

    return dict(
        aq=(per_head_in_out(wq) * scale).astype(matmul_dtype),     # scale folded into Q
        bq=(bq * scale).reshape(L, H, 1, hd),
        ak=per_head_in_out(wk).astype(matmul_dtype),
        bk=bk.reshape(L, H, 1, hd),
        av=per_head_in_out(wv).astype(matmul_dtype),
        bv=bv.reshape(L, H, 1, hd),
        # out_proj: attn = concat_ctx @ Wo^T  ->  per-head (hd, D) slabs, (in, out) layout
        ao=layers["wo"].transpose(0, 2, 1).reshape(L, H, hd, D).astype(matmul_dtype),
        bo=layers["bo"].reshape(L, 1, D),
        ln1w=layers["ln1w"].reshape(L, 1, D), ln1b=layers["ln1b"].reshape(L, 1, D),
        ln2w=layers["ln2w"].reshape(L, 1, D), ln2b=layers["ln2b"].reshape(L, 1, D),
        w1=layers["w1"].transpose(0, 2, 1).astype(matmul_dtype),    # (L, D, F)
        b1=layers["b1"].reshape(L, 1, -1),
        w2=layers["w2"].transpose(0, 2, 1).astype(matmul_dtype),    # (L, F, D)
        b2=layers["b2"].reshape(L, 1, D),
        pw1=head["pw1"].T.astype(matmul_dtype),                     # (D, 128)
        pb1=head["pb1"].reshape(1, -1),
        pw2=head["pw2"].T.astype(matmul_dtype),                     # (128, 1)
        pb2=head["pb2"].reshape(1, 1),
        cw=head["cw"].T.astype(matmul_dtype),                       # (D, num_classes)
        cb=head["cb"].reshape(1, -1),
    )


def _const_index_map(ndim):
    zeros = (0,) * ndim
    return lambda b: zeros


def _resident_spec(a):
    # Full-array block, constant index map: fetched into VMEM once, resident across grid steps.
    return pl.BlockSpec(a.shape, _const_index_map(a.ndim))


# ----------------------------------- driver -----------------------------------

def transformer_model(x, layers, head, nhead):
    B, S, D = x.shape
    params = prepare_params(layers, head, nhead)
    weights = [params[k] for k in KERNEL_PARAM_KEYS]
    L = int(params["aq"].shape[0])
    Fff = int(params["w1"].shape[2])
    nc = int(params["cw"].shape[1])
    hd = D // nhead

    # Advisory cost estimate for XLA's scheduler around the fused call.
    per_layer_flops = (3 * 2 * S * D * D                 # Q/K/V projections
                       + 2 * 2 * nhead * S * S * hd      # QK^T and P@V
                       + 2 * S * D * D                   # output projection
                       + 2 * 2 * S * D * Fff)            # feed-forward
    flops = B * (L * per_layer_flops + 2 * S * D * 128 + 2 * S * 128 + 2 * D * nc)
    transcendentals = B * (L * (nhead * S * S + S * Fff) + S * 128 + S)
    bytes_accessed = (int(x.size) * x.dtype.itemsize
                      + sum(int(w.size) * w.dtype.itemsize for w in weights)
                      + B * nc * x.dtype.itemsize)

    in_specs = [pl.BlockSpec((None, S, D), lambda b: (b, 0, 0))]      # one example per grid step
    in_specs += [_resident_spec(w) for w in weights]                  # weights resident in VMEM
    out_specs = pl.BlockSpec((None, 1, nc), lambda b: (b, 0, 0))

    out = pl.pallas_call(
        partial(model_kernel, nhead=nhead, num_layers=L),
        grid=(B,),
        in_specs=in_specs,
        out_specs=out_specs,
        out_shape=jax.ShapeDtypeStruct((B, 1, nc), x.dtype),
        compiler_params=pltpu.CompilerParams(
            # Batch axis is embarrassingly parallel -> uses both TensorCores on v7x;
            # on v5e/v6e it is a short sequential loop with resident weights.
            dimension_semantics=("parallel",),
            # Total resident footprint (weights + per-example activations) is well under 1 MiB.
            vmem_limit_bytes=32 * 1024 * 1024),
        cost_estimate=pl.CostEstimate(flops=flops, transcendentals=transcendentals,
                                      bytes_accessed=bytes_accessed),
    )(x, *weights)
    return out.reshape(B, nc)


# ------------------------------- parameter init -------------------------------
# Mirrors the PyTorch module's parameter layout: Linear weights are [out_features, in_features].

def init_params(key, d_model, nhead, num_layers, dim_feedforward, num_classes):
    def dense(k, out_f, in_f, scale=0.05):
        kw, kb = jax.random.split(k)
        return (jax.random.normal(kw, (out_f, in_f), jnp.float32) * scale,
                jax.random.normal(kb, (1, out_f), jnp.float32) * scale)

    keys = jax.random.split(key, num_layers + 1)
    per_layer = []
    for l in range(num_layers):
        ks = jax.random.split(keys[l], 4)
        wqkv, bqkv = dense(ks[0], 3 * d_model, d_model)     # in_proj of MHA
        wo, bo = dense(ks[1], d_model, d_model)             # out_proj of MHA
        w1, b1 = dense(ks[2], dim_feedforward, d_model)     # linear1
        w2, b2 = dense(ks[3], d_model, dim_feedforward)     # linear2
        per_layer.append(dict(
            wqkv=wqkv, bqkv=bqkv, wo=wo, bo=bo,
            ln1w=jnp.ones((1, d_model), jnp.float32),
            ln1b=jnp.zeros((1, d_model), jnp.float32),
            ln2w=jnp.ones((1, d_model), jnp.float32),
            ln2b=jnp.zeros((1, d_model), jnp.float32),
            w1=w1, b1=b1, w2=w2, b2=b2))
    layers = {k: jnp.stack([p[k] for p in per_layer], axis=0) for k in LAYER_KEYS}

    ks = jax.random.split(keys[-1], 3)
    pw1, pb1 = dense(ks[0], 128, d_model)                   # pooling Linear(d_model, 128)
    pw2, pb2 = dense(ks[1], 1, 128)                         # pooling Linear(128, 1)
    cw, cb = dense(ks[2], num_classes, d_model)             # classifier
    head = dict(pw1=pw1, pb1=pb1, pw2=pw2, pb2=pb2, cw=cw, cb=cb)
    return layers, head


if __name__ == "__main__":
    # small shapes: batch=2, seq=8, input_dim=d_model=32, nhead=4, layers=2, ff=64, classes=2
    B, S, D, NHEAD, NLAYERS, DFF, NCLS = 2, 8, 32, 4, 2, 64, 2
    key = jax.random.PRNGKey(0)
    kx, kp = jax.random.split(key)
    x = jax.random.normal(kx, (B, S, D), jnp.float32)
    layers, head = init_params(kp, D, NHEAD, NLAYERS, DFF, NCLS)

    logits = transformer_model(x, layers, head, NHEAD)
    jax.block_until_ready(logits)
    assert logits.shape == (B, NCLS) and logits.dtype == jnp.float32
    print("KERNEL_OK")
</pallas_src>

<mosaic_0001>
module attributes {stable_mosaic.version = 11 : i64} {
  func.func @model_kernel(%arg0: i32, %arg1: memref<1x8x32xf32, #tpu.memory_space<vmem>>, %arg2: memref<2x4x32x8xbf16, #tpu.memory_space<vmem>>, %arg3: memref<2x4x1x8xf32, #tpu.memory_space<vmem>>, %arg4: memref<2x4x32x8xbf16, #tpu.memory_space<vmem>>, %arg5: memref<2x4x1x8xf32, #tpu.memory_space<vmem>>, %arg6: memref<2x4x32x8xbf16, #tpu.memory_space<vmem>>, %arg7: memref<2x4x1x8xf32, #tpu.memory_space<vmem>>, %arg8: memref<2x4x8x32xbf16, #tpu.memory_space<vmem>>, %arg9: memref<2x1x32xf32, #tpu.memory_space<vmem>>, %arg10: memref<2x1x32xf32, #tpu.memory_space<vmem>>, %arg11: memref<2x1x32xf32, #tpu.memory_space<vmem>>, %arg12: memref<2x1x32xf32, #tpu.memory_space<vmem>>, %arg13: memref<2x1x32xf32, #tpu.memory_space<vmem>>, %arg14: memref<2x32x64xbf16, #tpu.memory_space<vmem>>, %arg15: memref<2x1x64xf32, #tpu.memory_space<vmem>>, %arg16: memref<2x64x32xbf16, #tpu.memory_space<vmem>>, %arg17: memref<2x1x32xf32, #tpu.memory_space<vmem>>, %arg18: memref<32x128xbf16, #tpu.memory_space<vmem>>, %arg19: memref<1x128xf32, #tpu.memory_space<vmem>>, %arg20: memref<128x1xbf16, #tpu.memory_space<vmem>>, %arg21: memref<1x1xf32, #tpu.memory_space<vmem>>, %arg22: memref<32x2xbf16, #tpu.memory_space<vmem>>, %arg23: memref<1x2xf32, #tpu.memory_space<vmem>>, %arg24: memref<1x1x2xf32, #tpu.memory_space<vmem>>) attributes {dimension_semantics = [#tpu.dimension_semantics<parallel>], iteration_bounds = array<i64: 2>, scalar_prefetch = 0 : i64, scratch_operands = 0 : i64, tpu.core_type = #tpu.core_type<tc>, window_params = [{transform_indices = @transform_0, window_bounds = array<i64: 1, 8, 32>}, {pipeline_mode = #tpu.pipeline_mode<synchronous>, transform_indices = @transform_1, window_bounds = array<i64: 2, 4, 32, 8>}, {pipeline_mode = #tpu.pipeline_mode<synchronous>, transform_indices = @transform_2, window_bounds = array<i64: 2, 4, 1, 8>}, {pipeline_mode = #tpu.pipeline_mode<synchronous>, transform_indices = @transform_3, window_bounds = array<i64: 2, 4, 32, 8>}, {pipeline_mode = #tpu.pipeline_mode<synchronous>, transform_indices = @transform_4, window_bounds = array<i64: 2, 4, 1, 8>}, {pipeline_mode = #tpu.pipeline_mode<synchronous>, transform_indices = @transform_5, window_bounds = array<i64: 2, 4, 32, 8>}, {pipeline_mode = #tpu.pipeline_mode<synchronous>, transform_indices = @transform_6, window_bounds = array<i64: 2, 4, 1, 8>}, {pipeline_mode = #tpu.pipeline_mode<synchronous>, transform_indices = @transform_7, window_bounds = array<i64: 2, 4, 8, 32>}, {pipeline_mode = #tpu.pipeline_mode<synchronous>, transform_indices = @transform_8, window_bounds = array<i64: 2, 1, 32>}, {pipeline_mode = #tpu.pipeline_mode<synchronous>, transform_indices = @transform_9, window_bounds = array<i64: 2, 1, 32>}, {pipeline_mode = #tpu.pipeline_mode<synchronous>, transform_indices = @transform_10, window_bounds = array<i64: 2, 1, 32>}, {pipeline_mode = #tpu.pipeline_mode<synchronous>, transform_indices = @transform_11, window_bounds = array<i64: 2, 1, 32>}, {pipeline_mode = #tpu.pipeline_mode<synchronous>, transform_indices = @transform_12, window_bounds = array<i64: 2, 1, 32>}, {pipeline_mode = #tpu.pipeline_mode<synchronous>, transform_indices = @transform_13, window_bounds = array<i64: 2, 32, 64>}, {pipeline_mode = #tpu.pipeline_mode<synchronous>, transform_indices = @transform_14, window_bounds = array<i64: 2, 1, 64>}, {pipeline_mode = #tpu.pipeline_mode<synchronous>, transform_indices = @transform_15, window_bounds = array<i64: 2, 64, 32>}, {pipeline_mode = #tpu.pipeline_mode<synchronous>, transform_indices = @transform_16, window_bounds = array<i64: 2, 1, 32>}, {pipeline_mode = #tpu.pipeline_mode<synchronous>, transform_indices = @transform_17, window_bounds = array<i64: 32, 128>}, {pipeline_mode = #tpu.pipeline_mode<synchronous>, transform_indices = @transform_18, window_bounds = array<i64: 1, 128>}, {pipeline_mode = #tpu.pipeline_mode<synchronous>, transform_indices = @transform_19, window_bounds = array<i64: 128, 1>}, {pipeline_mode = #tpu.pipeline_mode<synchronous>, transform_indices = @transform_20, window_bounds = array<i64: 1, 1>}, {pipeline_mode = #tpu.pipeline_mode<synchronous>, transform_indices = @transform_21, window_bounds = array<i64: 32, 2>}, {pipeline_mode = #tpu.pipeline_mode<synchronous>, transform_indices = @transform_22, window_bounds = array<i64: 1, 2>}, {transform_indices = @transform_23, window_bounds = array<i64: 1, 1, 2>}]} {
    %c0 = arith.constant 0 : index
    %c0_0 = arith.constant 0 : index
    %c0_1 = arith.constant 0 : index
    %0 = vector.load %arg1[%c0, %c0_0, %c0_1] : memref<1x8x32xf32, #tpu.memory_space<vmem>>, vector<1x8x32xf32>
    %1 = vector.shape_cast %0 : vector<1x8x32xf32> to vector<8x32xf32>
    %2 = arith.truncf %1 : vector<8x32xf32> to vector<8x32xbf16>
    %3 = vector.shape_cast %2 : vector<8x32xbf16> to vector<1x8x32xbf16>
    %4 = vector.shape_cast %3 : vector<1x8x32xbf16> to vector<1x8x32xbf16>
    %5 = vector.broadcast %4 : vector<1x8x32xbf16> to vector<4x8x32xbf16>
    %c0_2 = arith.constant 0 : index
    %c0_3 = arith.constant 0 : index
    %c0_4 = arith.constant 0 : index
    %c0_5 = arith.constant 0 : index
    %6 = vector.load %arg2[%c0_2, %c0_3, %c0_4, %c0_5] : memref<2x4x32x8xbf16, #tpu.memory_space<vmem>>, vector<1x4x32x8xbf16>
    %7 = vector.shape_cast %6 : vector<1x4x32x8xbf16> to vector<4x32x8xbf16>
    "tpu.trace_start"() <{level = 10 : i32, message = "hsd,hdk->hsk"}> : () -> ()
    %cst = arith.constant dense<0.000000e+00> : vector<4x8x8xf32>
    %8 = tpu.matmul %5, %7, %cst {dimension_numbers = #tpu.dot_dimension_numbers<[2], [1], [1], [2], [0, 0, 0, 1, 1, 2], [0], [0]>} : vector<4x8x32xbf16>, vector<4x32x8xbf16>, vector<4x8x8xf32> -> vector<4x8x8xf32>
    "tpu.trace_stop"() : () -> ()
    %c0_6 = arith.constant 0 : index
    %c0_7 = arith.constant 0 : index
    %c0_8 = arith.constant 0 : index
    %c0_9 = arith.constant 0 : index
    %9 = vector.load %arg3[%c0_6, %c0_7, %c0_8, %c0_9] : memref<2x4x1x8xf32, #tpu.memory_space<vmem>>, vector<1x4x1x8xf32>
    %10 = vector.shape_cast %9 : vector<1x4x1x8xf32> to vector<4x1x8xf32>
    %11 = vector.broadcast %10 : vector<4x1x8xf32> to vector<4x8x8xf32>
    %12 = arith.addf %8, %11 : vector<4x8x8xf32>
    %c0_10 = arith.constant 0 : index
    %c0_11 = arith.constant 0 : index
    %c0_12 = arith.constant 0 : index
    %c0_13 = arith.constant 0 : index
    %13 = vector.load %arg4[%c0_10, %c0_11, %c0_12, %c0_13] : memref<2x4x32x8xbf16, #tpu.memory_space<vmem>>, vector<1x4x32x8xbf16>
    %14 = vector.shape_cast %13 : vector<1x4x32x8xbf16> to vector<4x32x8xbf16>
    "tpu.trace_start"() <{level = 10 : i32, message = "hsd,hdk->hsk"}> : () -> ()
    %cst_14 = arith.constant dense<0.000000e+00> : vector<4x8x8xf32>
    %15 = tpu.matmul %5, %14, %cst_14 {dimension_numbers = #tpu.dot_dimension_numbers<[2], [1], [1], [2], [0, 0, 0, 1, 1, 2], [0], [0]>} : vector<4x8x32xbf16>, vector<4x32x8xbf16>, vector<4x8x8xf32> -> vector<4x8x8xf32>
    "tpu.trace_stop"() : () -> ()
    %c0_15 = arith.constant 0 : index
    %c0_16 = arith.constant 0 : index
    %c0_17 = arith.constant 0 : index
    %c0_18 = arith.constant 0 : index
    %16 = vector.load %arg5[%c0_15, %c0_16, %c0_17, %c0_18] : memref<2x4x1x8xf32, #tpu.memory_space<vmem>>, vector<1x4x1x8xf32>
    %17 = vector.shape_cast %16 : vector<1x4x1x8xf32> to vector<4x1x8xf32>
    %18 = vector.broadcast %17 : vector<4x1x8xf32> to vector<4x8x8xf32>
    %19 = arith.addf %15, %18 : vector<4x8x8xf32>
    %c0_19 = arith.constant 0 : index
    %c0_20 = arith.constant 0 : index
    %c0_21 = arith.constant 0 : index
    %c0_22 = arith.constant 0 : index
    %20 = vector.load %arg6[%c0_19, %c0_20, %c0_21, %c0_22] : memref<2x4x32x8xbf16, #tpu.memory_space<vmem>>, vector<1x4x32x8xbf16>
    %21 = vector.shape_cast %20 : vector<1x4x32x8xbf16> to vector<4x32x8xbf16>
    "tpu.trace_start"() <{level = 10 : i32, message = "hsd,hdk->hsk"}> : () -> ()
    %cst_23 = arith.constant dense<0.000000e+00> : vector<4x8x8xf32>
    %22 = tpu.matmul %5, %21, %cst_23 {dimension_numbers = #tpu.dot_dimension_numbers<[2], [1], [1], [2], [0, 0, 0, 1, 1, 2], [0], [0]>} : vector<4x8x32xbf16>, vector<4x32x8xbf16>, vector<4x8x8xf32> -> vector<4x8x8xf32>
    "tpu.trace_stop"() : () -> ()
    %c0_24 = arith.constant 0 : index
    %c0_25 = arith.constant 0 : index
    %c0_26 = arith.constant 0 : index
    %c0_27 = arith.constant 0 : index
    %23 = vector.load %arg7[%c0_24, %c0_25, %c0_26, %c0_27] : memref<2x4x1x8xf32, #tpu.memory_space<vmem>>, vector<1x4x1x8xf32>
    %24 = vector.shape_cast %23 : vector<1x4x1x8xf32> to vector<4x1x8xf32>
    %25 = vector.broadcast %24 : vector<4x1x8xf32> to vector<4x8x8xf32>
    %26 = arith.addf %22, %25 : vector<4x8x8xf32>
    %27 = arith.truncf %12 : vector<4x8x8xf32> to vector<4x8x8xbf16>
    %28 = arith.truncf %19 : vector<4x8x8xf32> to vector<4x8x8xbf16>
    "tpu.trace_start"() <{level = 10 : i32, message = "hqc,hkc->hqk"}> : () -> ()
    %cst_28 = arith.constant dense<0.000000e+00> : vector<4x8x8xf32>
    %29 = tpu.matmul %27, %28, %cst_28 {dimension_numbers = #tpu.dot_dimension_numbers<[2], [2], [1], [1], [0, 0, 0, 1, 1, 1], [0], [0]>} : vector<4x8x8xbf16>, vector<4x8x8xbf16>, vector<4x8x8xf32> -> vector<4x8x8xf32>
    "tpu.trace_stop"() : () -> ()
    %cst_29 = arith.constant dense<0xFF800000> : vector<4x8xf32>
    %30 = vector.multi_reduction <maximumf>, %29, %cst_29 [2] : vector<4x8x8xf32> to vector<4x8xf32>
    %31 = vector.shape_cast %30 : vector<4x8xf32> to vector<4x8x1xf32>
    %32 = vector.broadcast %31 : vector<4x8x1xf32> to vector<4x8x8xf32>
    %33 = arith.subf %29, %32 : vector<4x8x8xf32>
    %34 = math.exp %33 : vector<4x8x8xf32>
    %cst_30 = arith.constant dense<0.000000e+00> : vector<4x8xf32>
    %35 = vector.multi_reduction <add>, %34, %cst_30 [2] : vector<4x8x8xf32> to vector<4x8xf32>
    %36 = vector.shape_cast %35 : vector<4x8xf32> to vector<4x8x1xf32>
    %37 = vector.broadcast %36 : vector<4x8x1xf32> to vector<4x8x8xf32>
    %38 = arith.divf %34, %37 : vector<4x8x8xf32>
    %39 = arith.truncf %38 : vector<4x8x8xf32> to vector<4x8x8xbf16>
    %40 = arith.truncf %26 : vector<4x8x8xf32> to vector<4x8x8xbf16>
    "tpu.trace_start"() <{level = 10 : i32, message = "hqk,hkc->hqc"}> : () -> ()
    %cst_31 = arith.constant dense<0.000000e+00> : vector<4x8x8xf32>
    %41 = tpu.matmul %39, %40, %cst_31 {dimension_numbers = #tpu.dot_dimension_numbers<[2], [1], [1], [2], [0, 0, 0, 1, 1, 2], [0], [0]>} : vector<4x8x8xbf16>, vector<4x8x8xbf16>, vector<4x8x8xf32> -> vector<4x8x8xf32>
    "tpu.trace_stop"() : () -> ()
    %42 = arith.truncf %41 : vector<4x8x8xf32> to vector<4x8x8xbf16>
    %c0_32 = arith.constant 0 : index
    %c0_33 = arith.constant 0 : index
    %c0_34 = arith.constant 0 : index
    %c0_35 = arith.constant 0 : index
    %43 = vector.load %arg8[%c0_32, %c0_33, %c0_34, %c0_35] : memref<2x4x8x32xbf16, #tpu.memory_space<vmem>>, vector<1x4x8x32xbf16>
    %44 = vector.shape_cast %43 : vector<1x4x8x32xbf16> to vector<4x8x32xbf16>
    "tpu.trace_start"() <{level = 10 : i32, message = "hqc,hcd->hqd"}> : () -> ()
    %cst_36 = arith.constant dense<0.000000e+00> : vector<4x8x32xf32>
    %45 = tpu.matmul %42, %44, %cst_36 {dimension_numbers = #tpu.dot_dimension_numbers<[2], [1], [1], [2], [0, 0, 0, 1, 1, 2], [0], [0]>} : vector<4x8x8xbf16>, vector<4x8x32xbf16>, vector<4x8x32xf32> -> vector<4x8x32xf32>
    "tpu.trace_stop"() : () -> ()
    %cst_37 = arith.constant dense<0.000000e+00> : vector<8x32xf32>
    %46 = vector.multi_reduction <add>, %45, %cst_37 [0] : vector<4x8x32xf32> to vector<8x32xf32>
    %c0_38 = arith.constant 0 : index
    %c0_39 = arith.constant 0 : index
    %c0_40 = arith.constant 0 : index
    %47 = vector.load %arg9[%c0_38, %c0_39, %c0_40] : memref<2x1x32xf32, #tpu.memory_space<vmem>>, vector<1x1x32xf32>
    %48 = vector.shape_cast %47 : vector<1x1x32xf32> to vector<1x32xf32>
    %49 = vector.broadcast %48 : vector<1x32xf32> to vector<8x32xf32>
    %50 = arith.addf %46, %49 : vector<8x32xf32>
    %51 = arith.addf %1, %50 : vector<8x32xf32>
    %c0_41 = arith.constant 0 : index
    %c0_42 = arith.constant 0 : index
    %c0_43 = arith.constant 0 : index
    %52 = vector.load %arg10[%c0_41, %c0_42, %c0_43] : memref<2x1x32xf32, #tpu.memory_space<vmem>>, vector<1x1x32xf32>
    %53 = vector.shape_cast %52 : vector<1x1x32xf32> to vector<1x32xf32>
    %c0_44 = arith.constant 0 : index
    %c0_45 = arith.constant 0 : index
    %c0_46 = arith.constant 0 : index
    %54 = vector.load %arg11[%c0_44, %c0_45, %c0_46] : memref<2x1x32xf32, #tpu.memory_space<vmem>>, vector<1x1x32xf32>
    %55 = vector.shape_cast %54 : vector<1x1x32xf32> to vector<1x32xf32>
    %cst_47 = arith.constant dense<0.000000e+00> : vector<8xf32>
    %56 = vector.multi_reduction <add>, %51, %cst_47 [1] : vector<8x32xf32> to vector<8xf32>
    %57 = vector.shape_cast %56 : vector<8xf32> to vector<8x1xf32>
    %cst_48 = arith.constant 3.200000e+01 : f32
    %58 = vector.broadcast %cst_48 : f32 to vector<8x1xf32>
    %59 = arith.divf %57, %58 : vector<8x1xf32>
    %60 = vector.broadcast %59 : vector<8x1xf32> to vector<8x32xf32>
    %61 = arith.subf %51, %60 : vector<8x32xf32>
    %62 = arith.mulf %61, %61 : vector<8x32xf32>
    %cst_49 = arith.constant dense<0.000000e+00> : vector<8xf32>
    %63 = vector.multi_reduction <add>, %62, %cst_49 [1] : vector<8x32xf32> to vector<8xf32>
    %64 = vector.shape_cast %63 : vector<8xf32> to vector<8x1xf32>
    %cst_50 = arith.constant 3.200000e+01 : f32
    %65 = vector.broadcast %cst_50 : f32 to vector<8x1xf32>
    %66 = arith.divf %64, %65 : vector<8x1xf32>
    %67 = vector.broadcast %59 : vector<8x1xf32> to vector<8x32xf32>
    %68 = arith.subf %51, %67 : vector<8x32xf32>
    %cst_51 = arith.constant 9.99999974E-6 : f32
    %69 = vector.broadcast %cst_51 : f32 to vector<8x1xf32>
    %70 = arith.addf %66, %69 : vector<8x1xf32>
    %71 = math.rsqrt %70 : vector<8x1xf32>
    %72 = vector.broadcast %71 : vector<8x1xf32> to vector<8x32xf32>
    %73 = arith.mulf %68, %72 : vector<8x32xf32>
    %74 = vector.broadcast %53 : vector<1x32xf32> to vector<8x32xf32>
    %75 = arith.mulf %73, %74 : vector<8x32xf32>
    %76 = vector.broadcast %55 : vector<1x32xf32> to vector<8x32xf32>
    %77 = arith.addf %75, %76 : vector<8x32xf32>
    %c0_52 = arith.constant 0 : index
    %c0_53 = arith.constant 0 : index
    %c0_54 = arith.constant 0 : index
    %78 = vector.load %arg14[%c0_52, %c0_53, %c0_54] : memref<2x32x64xbf16, #tpu.memory_space<vmem>>, vector<1x32x64xbf16>
    %79 = vector.shape_cast %78 : vector<1x32x64xbf16> to vector<32x64xbf16>
    %c0_55 = arith.constant 0 : index
    %c0_56 = arith.constant 0 : index
    %c0_57 = arith.constant 0 : index
    %80 = vector.load %arg15[%c0_55, %c0_56, %c0_57] : memref<2x1x64xf32, #tpu.memory_space<vmem>>, vector<1x1x64xf32>
    %81 = vector.shape_cast %80 : vector<1x1x64xf32> to vector<1x64xf32>
    %82 = arith.truncf %77 : vector<8x32xf32> to vector<8x32xbf16>
    %cst_58 = arith.constant dense<0.000000e+00> : vector<8x64xf32>
    %83 = tpu.matmul %82, %79, %cst_58 {dimension_numbers = #tpu.dot_dimension_numbers<[1], [0], [0], [1], [0, 0, 1, 1], [], []>} : vector<8x32xbf16>, vector<32x64xbf16>, vector<8x64xf32> -> vector<8x64xf32>
    %84 = vector.broadcast %81 : vector<1x64xf32> to vector<8x64xf32>
    %85 = arith.addf %83, %84 : vector<8x64xf32>
    %86 = arith.mulf %85, %85 : vector<8x64xf32>
    %87 = arith.mulf %85, %86 : vector<8x64xf32>
    %cst_59 = arith.constant 4.471500e-02 : f32
    %88 = vector.broadcast %cst_59 : f32 to vector<8x64xf32>
    %89 = arith.mulf %88, %87 : vector<8x64xf32>
    %90 = arith.addf %85, %89 : vector<8x64xf32>
    %cst_60 = arith.constant 0.797884583 : f32
    %91 = vector.broadcast %cst_60 : f32 to vector<8x64xf32>
    %92 = arith.mulf %91, %90 : vector<8x64xf32>
    %93 = math.tanh %92 : vector<8x64xf32>
    %cst_61 = arith.constant 1.000000e+00 : f32
    %94 = vector.broadcast %cst_61 : f32 to vector<8x64xf32>
    %95 = arith.addf %94, %93 : vector<8x64xf32>
    %cst_62 = arith.constant 5.000000e-01 : f32
    %96 = vector.broadcast %cst_62 : f32 to vector<8x64xf32>
    %97 = arith.mulf %96, %95 : vector<8x64xf32>
    %98 = arith.mulf %85, %97 : vector<8x64xf32>
    %c0_63 = arith.constant 0 : index
    %c0_64 = arith.constant 0 : index
    %c0_65 = arith.constant 0 : index
    %99 = vector.load %arg16[%c0_63, %c0_64, %c0_65] : memref<2x64x32xbf16, #tpu.memory_space<vmem>>, vector<1x64x32xbf16>
    %100 = vector.shape_cast %99 : vector<1x64x32xbf16> to vector<64x32xbf16>
    %c0_66 = arith.constant 0 : index
    %c0_67 = arith.constant 0 : index
    %c0_68 = arith.constant 0 : index
    %101 = vector.load %arg17[%c0_66, %c0_67, %c0_68] : memref<2x1x32xf32, #tpu.memory_space<vmem>>, vector<1x1x32xf32>
    %102 = vector.shape_cast %101 : vector<1x1x32xf32> to vector<1x32xf32>
    %103 = arith.truncf %98 : vector<8x64xf32> to vector<8x64xbf16>
    %cst_69 = arith.constant dense<0.000000e+00> : vector<8x32xf32>
    %104 = tpu.matmul %103, %100, %cst_69 {dimension_numbers = #tpu.dot_dimension_numbers<[1], [0], [0], [1], [0, 0, 1, 1], [], []>} : vector<8x64xbf16>, vector<64x32xbf16>, vector<8x32xf32> -> vector<8x32xf32>
    %105 = vector.broadcast %102 : vector<1x32xf32> to vector<8x32xf32>
    %106 = arith.addf %104, %105 : vector<8x32xf32>
    %107 = arith.addf %77, %106 : vector<8x32xf32>
    %c0_70 = arith.constant 0 : index
    %c0_71 = arith.constant 0 : index
    %c0_72 = arith.constant 0 : index
    %108 = vector.load %arg12[%c0_70, %c0_71, %c0_72] : memref<2x1x32xf32, #tpu.memory_space<vmem>>, vector<1x1x32xf32>
    %109 = vector.shape_cast %108 : vector<1x1x32xf32> to vector<1x32xf32>
    %c0_73 = arith.constant 0 : index
    %c0_74 = arith.constant 0 : index
    %c0_75 = arith.constant 0 : index
    %110 = vector.load %arg13[%c0_73, %c0_74, %c0_75] : memref<2x1x32xf32, #tpu.memory_space<vmem>>, vector<1x1x32xf32>
    %111 = vector.shape_cast %110 : vector<1x1x32xf32> to vector<1x32xf32>
    %cst_76 = arith.constant dense<0.000000e+00> : vector<8xf32>
    %112 = vector.multi_reduction <add>, %107, %cst_76 [1] : vector<8x32xf32> to vector<8xf32>
    %113 = vector.shape_cast %112 : vector<8xf32> to vector<8x1xf32>
    %cst_77 = arith.constant 3.200000e+01 : f32
    %114 = vector.broadcast %cst_77 : f32 to vector<8x1xf32>
    %115 = arith.divf %113, %114 : vector<8x1xf32>
    %116 = vector.broadcast %115 : vector<8x1xf32> to vector<8x32xf32>
    %117 = arith.subf %107, %116 : vector<8x32xf32>
    %118 = arith.mulf %117, %117 : vector<8x32xf32>
    %cst_78 = arith.constant dense<0.000000e+00> : vector<8xf32>
    %119 = vector.multi_reduction <add>, %118, %cst_78 [1] : vector<8x32xf32> to vector<8xf32>
    %120 = vector.shape_cast %119 : vector<8xf32> to vector<8x1xf32>
    %cst_79 = arith.constant 3.200000e+01 : f32
    %121 = vector.broadcast %cst_79 : f32 to vector<8x1xf32>
    %122 = arith.divf %120, %121 : vector<8x1xf32>
    %123 = vector.broadcast %115 : vector<8x1xf32> to vector<8x32xf32>
    %124 = arith.subf %107, %123 : vector<8x32xf32>
    %cst_80 = arith.constant 9.99999974E-6 : f32
    %125 = vector.broadcast %cst_80 : f32 to vector<8x1xf32>
    %126 = arith.addf %122, %125 : vector<8x1xf32>
    %127 = math.rsqrt %126 : vector<8x1xf32>
    %128 = vector.broadcast %127 : vector<8x1xf32> to vector<8x32xf32>
    %129 = arith.mulf %124, %128 : vector<8x32xf32>
    %130 = vector.broadcast %109 : vector<1x32xf32> to vector<8x32xf32>
    %131 = arith.mulf %129, %130 : vector<8x32xf32>
    %132 = vector.broadcast %111 : vector<1x32xf32> to vector<8x32xf32>
    %133 = arith.addf %131, %132 : vector<8x32xf32>
    %134 = arith.truncf %133 : vector<8x32xf32> to vector<8x32xbf16>
    %135 = vector.shape_cast %134 : vector<8x32xbf16> to vector<1x8x32xbf16>
    %136 = vector.shape_cast %135 : vector<1x8x32xbf16> to vector<1x8x32xbf16>
    %137 = vector.broadcast %136 : vector<1x8x32xbf16> to vector<4x8x32xbf16>
    %c1 = arith.constant 1 : index
    %c0_81 = arith.constant 0 : index
    %c0_82 = arith.constant 0 : index
    %c0_83 = arith.constant 0 : index
    %138 = vector.load %arg2[%c1, %c0_81, %c0_82, %c0_83] : memref<2x4x32x8xbf16, #tpu.memory_space<vmem>>, vector<1x4x32x8xbf16>
    %139 = vector.shape_cast %138 : vector<1x4x32x8xbf16> to vector<4x32x8xbf16>
    "tpu.trace_start"() <{level = 10 : i32, message = "hsd,hdk->hsk"}> : () -> ()
    %cst_84 = arith.constant dense<0.000000e+00> : vector<4x8x8xf32>
    %140 = tpu.matmul %137, %139, %cst_84 {dimension_numbers = #tpu.dot_dimension_numbers<[2], [1], [1], [2], [0, 0, 0, 1, 1, 2], [0], [0]>} : vector<4x8x32xbf16>, vector<4x32x8xbf16>, vector<4x8x8xf32> -> vector<4x8x8xf32>
    "tpu.trace_stop"() : () -> ()
    %c1_85 = arith.constant 1 : index
    %c0_86 = arith.constant 0 : index
    %c0_87 = arith.constant 0 : index
    %c0_88 = arith.constant 0 : index
    %141 = vector.load %arg3[%c1_85, %c0_86, %c0_87, %c0_88] : memref<2x4x1x8xf32, #tpu.memory_space<vmem>>, vector<1x4x1x8xf32>
    %142 = vector.shape_cast %141 : vector<1x4x1x8xf32> to vector<4x1x8xf32>
    %143 = vector.broadcast %142 : vector<4x1x8xf32> to vector<4x8x8xf32>
    %144 = arith.addf %140, %143 : vector<4x8x8xf32>
    %c1_89 = arith.constant 1 : index
    %c0_90 = arith.constant 0 : index
    %c0_91 = arith.constant 0 : index
    %c0_92 = arith.constant 0 : index
    %145 = vector.load %arg4[%c1_89, %c0_90, %c0_91, %c0_92] : memref<2x4x32x8xbf16, #tpu.memory_space<vmem>>, vector<1x4x32x8xbf16>
    %146 = vector.shape_cast %145 : vector<1x4x32x8xbf16> to vector<4x32x8xbf16>
    "tpu.trace_start"() <{level = 10 : i32, message = "hsd,hdk->hsk"}> : () -> ()
    %cst_93 = arith.constant dense<0.000000e+00> : vector<4x8x8xf32>
    %147 = tpu.matmul %137, %146, %cst_93 {dimension_numbers = #tpu.dot_dimension_numbers<[2], [1], [1], [2], [0, 0, 0, 1, 1, 2], [0], [0]>} : vector<4x8x32xbf16>, vector<4x32x8xbf16>, vector<4x8x8xf32> -> vector<4x8x8xf32>
    "tpu.trace_stop"() : () -> ()
    %c1_94 = arith.constant 1 : index
    %c0_95 = arith.constant 0 : index
    %c0_96 = arith.constant 0 : index
    %c0_97 = arith.constant 0 : index
    %148 = vector.load %arg5[%c1_94, %c0_95, %c0_96, %c0_97] : memref<2x4x1x8xf32, #tpu.memory_space<vmem>>, vector<1x4x1x8xf32>
    %149 = vector.shape_cast %148 : vector<1x4x1x8xf32> to vector<4x1x8xf32>
    %150 = vector.broadcast %149 : vector<4x1x8xf32> to vector<4x8x8xf32>
    %151 = arith.addf %147, %150 : vector<4x8x8xf32>
    %c1_98 = arith.constant 1 : index
    %c0_99 = arith.constant 0 : index
    %c0_100 = arith.constant 0 : index
    %c0_101 = arith.constant 0 : index
    %152 = vector.load %arg6[%c1_98, %c0_99, %c0_100, %c0_101] : memref<2x4x32x8xbf16, #tpu.memory_space<vmem>>, vector<1x4x32x8xbf16>
    %153 = vector.shape_cast %152 : vector<1x4x32x8xbf16> to vector<4x32x8xbf16>
    "tpu.trace_start"() <{level = 10 : i32, message = "hsd,hdk->hsk"}> : () -> ()
    %cst_102 = arith.constant dense<0.000000e+00> : vector<4x8x8xf32>
    %154 = tpu.matmul %137, %153, %cst_102 {dimension_numbers = #tpu.dot_dimension_numbers<[2], [1], [1], [2], [0, 0, 0, 1, 1, 2], [0], [0]>} : vector<4x8x32xbf16>, vector<4x32x8xbf16>, vector<4x8x8xf32> -> vector<4x8x8xf32>
    "tpu.trace_stop"() : () -> ()
    %c1_103 = arith.constant 1 : index
    %c0_104 = arith.constant 0 : index
    %c0_105 = arith.constant 0 : index
    %c0_106 = arith.constant 0 : index
    %155 = vector.load %arg7[%c1_103, %c0_104, %c0_105, %c0_106] : memref<2x4x1x8xf32, #tpu.memory_space<vmem>>, vector<1x4x1x8xf32>
    %156 = vector.shape_cast %155 : vector<1x4x1x8xf32> to vector<4x1x8xf32>
    %157 = vector.broadcast %156 : vector<4x1x8xf32> to vector<4x8x8xf32>
    %158 = arith.addf %154, %157 : vector<4x8x8xf32>
    %159 = arith.truncf %144 : vector<4x8x8xf32> to vector<4x8x8xbf16>
    %160 = arith.truncf %151 : vector<4x8x8xf32> to vector<4x8x8xbf16>
    "tpu.trace_start"() <{level = 10 : i32, message = "hqc,hkc->hqk"}> : () -> ()
    %cst_107 = arith.constant dense<0.000000e+00> : vector<4x8x8xf32>
    %161 = tpu.matmul %159, %160, %cst_107 {dimension_numbers = #tpu.dot_dimension_numbers<[2], [2], [1], [1], [0, 0, 0, 1, 1, 1], [0], [0]>} : vector<4x8x8xbf16>, vector<4x8x8xbf16>, vector<4x8x8xf32> -> vector<4x8x8xf32>
    "tpu.trace_stop"() : () -> ()
    %cst_108 = arith.constant dense<0xFF800000> : vector<4x8xf32>
    %162 = vector.multi_reduction <maximumf>, %161, %cst_108 [2] : vector<4x8x8xf32> to vector<4x8xf32>
    %163 = vector.shape_cast %162 : vector<4x8xf32> to vector<4x8x1xf32>
    %164 = vector.broadcast %163 : vector<4x8x1xf32> to vector<4x8x8xf32>
    %165 = arith.subf %161, %164 : vector<4x8x8xf32>
    %166 = math.exp %165 : vector<4x8x8xf32>
    %cst_109 = arith.constant dense<0.000000e+00> : vector<4x8xf32>
    %167 = vector.multi_reduction <add>, %166, %cst_109 [2] : vector<4x8x8xf32> to vector<4x8xf32>
    %168 = vector.shape_cast %167 : vector<4x8xf32> to vector<4x8x1xf32>
    %169 = vector.broadcast %168 : vector<4x8x1xf32> to vector<4x8x8xf32>
    %170 = arith.divf %166, %169 : vector<4x8x8xf32>
    %171 = arith.truncf %170 : vector<4x8x8xf32> to vector<4x8x8xbf16>
    %172 = arith.truncf %158 : vector<4x8x8xf32> to vector<4x8x8xbf16>
    "tpu.trace_start"() <{level = 10 : i32, message = "hqk,hkc->hqc"}> : () -> ()
    %cst_110 = arith.constant dense<0.000000e+00> : vector<4x8x8xf32>
    %173 = tpu.matmul %171, %172, %cst_110 {dimension_numbers = #tpu.dot_dimension_numbers<[2], [1], [1], [2], [0, 0, 0, 1, 1, 2], [0], [0]>} : vector<4x8x8xbf16>, vector<4x8x8xbf16>, vector<4x8x8xf32> -> vector<4x8x8xf32>
    "tpu.trace_stop"() : () -> ()
    %174 = arith.truncf %173 : vector<4x8x8xf32> to vector<4x8x8xbf16>
    %c1_111 = arith.constant 1 : index
    %c0_112 = arith.constant 0 : index
    %c0_113 = arith.constant 0 : index
    %c0_114 = arith.constant 0 : index
    %175 = vector.load %arg8[%c1_111, %c0_112, %c0_113, %c0_114] : memref<2x4x8x32xbf16, #tpu.memory_space<vmem>>, vector<1x4x8x32xbf16>
    %176 = vector.shape_cast %175 : vector<1x4x8x32xbf16> to vector<4x8x32xbf16>
    "tpu.trace_start"() <{level = 10 : i32, message = "hqc,hcd->hqd"}> : () -> ()
    %cst_115 = arith.constant dense<0.000000e+00> : vector<4x8x32xf32>
    %177 = tpu.matmul %174, %176, %cst_115 {dimension_numbers = #tpu.dot_dimension_numbers<[2], [1], [1], [2], [0, 0, 0, 1, 1, 2], [0], [0]>} : vector<4x8x8xbf16>, vector<4x8x32xbf16>, vector<4x8x32xf32> -> vector<4x8x32xf32>
    "tpu.trace_stop"() : () -> ()
    %cst_116 = arith.constant dense<0.000000e+00> : vector<8x32xf32>
    %178 = vector.multi_reduction <add>, %177, %cst_116 [0] : vector<4x8x32xf32> to vector<8x32xf32>
    %c1_117 = arith.constant 1 : index
    %c0_118 = arith.constant 0 : index
    %c0_119 = arith.constant 0 : index
    %179 = vector.load %arg9[%c1_117, %c0_118, %c0_119] : memref<2x1x32xf32, #tpu.memory_space<vmem>>, vector<1x1x32xf32>
    %180 = vector.shape_cast %179 : vector<1x1x32xf32> to vector<1x32xf32>
    %181 = vector.broadcast %180 : vector<1x32xf32> to vector<8x32xf32>
    %182 = arith.addf %178, %181 : vector<8x32xf32>
    %183 = arith.addf %133, %182 : vector<8x32xf32>
    %c1_120 = arith.constant 1 : index
    %c0_121 = arith.constant 0 : index
    %c0_122 = arith.constant 0 : index
    %184 = vector.load %arg10[%c1_120, %c0_121, %c0_122] : memref<2x1x32xf32, #tpu.memory_space<vmem>>, vector<1x1x32xf32>
    %185 = vector.shape_cast %184 : vector<1x1x32xf32> to vector<1x32xf32>
    %c1_123 = arith.constant 1 : index
    %c0_124 = arith.constant 0 : index
    %c0_125 = arith.constant 0 : index
    %186 = vector.load %arg11[%c1_123, %c0_124, %c0_125] : memref<2x1x32xf32, #tpu.memory_space<vmem>>, vector<1x1x32xf32>
    %187 = vector.shape_cast %186 : vector<1x1x32xf32> to vector<1x32xf32>
    %cst_126 = arith.constant dense<0.000000e+00> : vector<8xf32>
    %188 = vector.multi_reduction <add>, %183, %cst_126 [1] : vector<8x32xf32> to vector<8xf32>
    %189 = vector.shape_cast %188 : vector<8xf32> to vector<8x1xf32>
    %cst_127 = arith.constant 3.200000e+01 : f32
    %190 = vector.broadcast %cst_127 : f32 to vector<8x1xf32>
    %191 = arith.divf %189, %190 : vector<8x1xf32>
    %192 = vector.broadcast %191 : vector<8x1xf32> to vector<8x32xf32>
    %193 = arith.subf %183, %192 : vector<8x32xf32>
    %194 = arith.mulf %193, %193 : vector<8x32xf32>
    %cst_128 = arith.constant dense<0.000000e+00> : vector<8xf32>
    %195 = vector.multi_reduction <add>, %194, %cst_128 [1] : vector<8x32xf32> to vector<8xf32>
    %196 = vector.shape_cast %195 : vector<8xf32> to vector<8x1xf32>
    %cst_129 = arith.constant 3.200000e+01 : f32
    %197 = vector.broadcast %cst_129 : f32 to vector<8x1xf32>
    %198 = arith.divf %196, %197 : vector<8x1xf32>
    %199 = vector.broadcast %191 : vector<8x1xf32> to vector<8x32xf32>
    %200 = arith.subf %183, %199 : vector<8x32xf32>
    %cst_130 = arith.constant 9.99999974E-6 : f32
    %201 = vector.broadcast %cst_130 : f32 to vector<8x1xf32>
    %202 = arith.addf %198, %201 : vector<8x1xf32>
    %203 = math.rsqrt %202 : vector<8x1xf32>
    %204 = vector.broadcast %203 : vector<8x1xf32> to vector<8x32xf32>
    %205 = arith.mulf %200, %204 : vector<8x32xf32>
    %206 = vector.broadcast %185 : vector<1x32xf32> to vector<8x32xf32>
    %207 = arith.mulf %205, %206 : vector<8x32xf32>
    %208 = vector.broadcast %187 : vector<1x32xf32> to vector<8x32xf32>
    %209 = arith.addf %207, %208 : vector<8x32xf32>
    %c1_131 = arith.constant 1 : index
    %c0_132 = arith.constant 0 : index
    %c0_133 = arith.constant 0 : index
    %210 = vector.load %arg14[%c1_131, %c0_132, %c0_133] : memref<2x32x64xbf16, #tpu.memory_space<vmem>>, vector<1x32x64xbf16>
    %211 = vector.shape_cast %210 : vector<1x32x64xbf16> to vector<32x64xbf16>
    %c1_134 = arith.constant 1 : index
    %c0_135 = arith.constant 0 : index
    %c0_136 = arith.constant 0 : index
    %212 = vector.load %arg15[%c1_134, %c0_135, %c0_136] : memref<2x1x64xf32, #tpu.memory_space<vmem>>, vector<1x1x64xf32>
    %213 = vector.shape_cast %212 : vector<1x1x64xf32> to vector<1x64xf32>
    %214 = arith.truncf %209 : vector<8x32xf32> to vector<8x32xbf16>
    %cst_137 = arith.constant dense<0.000000e+00> : vector<8x64xf32>
    %215 = tpu.matmul %214, %211, %cst_137 {dimension_numbers = #tpu.dot_dimension_numbers<[1], [0], [0], [1], [0, 0, 1, 1], [], []>} : vector<8x32xbf16>, vector<32x64xbf16>, vector<8x64xf32> -> vector<8x64xf32>
    %216 = vector.broadcast %213 : vector<1x64xf32> to vector<8x64xf32>
    %217 = arith.addf %215, %216 : vector<8x64xf32>
    %218 = arith.mulf %217, %217 : vector<8x64xf32>
    %219 = arith.mulf %217, %218 : vector<8x64xf32>
    %cst_138 = arith.constant 4.471500e-02 : f32
    %220 = vector.broadcast %cst_138 : f32 to vector<8x64xf32>
    %221 = arith.mulf %220, %219 : vector<8x64xf32>
    %222 = arith.addf %217, %221 : vector<8x64xf32>
    %cst_139 = arith.constant 0.797884583 : f32
    %223 = vector.broadcast %cst_139 : f32 to vector<8x64xf32>
    %224 = arith.mulf %223, %222 : vector<8x64xf32>
    %225 = math.tanh %224 : vector<8x64xf32>
    %cst_140 = arith.constant 1.000000e+00 : f32
    %226 = vector.broadcast %cst_140 : f32 to vector<8x64xf32>
    %227 = arith.addf %226, %225 : vector<8x64xf32>
    %cst_141 = arith.constant 5.000000e-01 : f32
    %228 = vector.broadcast %cst_141 : f32 to vector<8x64xf32>
    %229 = arith.mulf %228, %227 : vector<8x64xf32>
    %230 = arith.mulf %217, %229 : vector<8x64xf32>
    %c1_142 = arith.constant 1 : index
    %c0_143 = arith.constant 0 : index
    %c0_144 = arith.constant 0 : index
    %231 = vector.load %arg16[%c1_142, %c0_143, %c0_144] : memref<2x64x32xbf16, #tpu.memory_space<vmem>>, vector<1x64x32xbf16>
    %232 = vector.shape_cast %231 : vector<1x64x32xbf16> to vector<64x32xbf16>
    %c1_145 = arith.constant 1 : index
    %c0_146 = arith.constant 0 : index
    %c0_147 = arith.constant 0 : index
    %233 = vector.load %arg17[%c1_145, %c0_146, %c0_147] : memref<2x1x32xf32, #tpu.memory_space<vmem>>, vector<1x1x32xf32>
    %234 = vector.shape_cast %233 : vector<1x1x32xf32> to vector<1x32xf32>
    %235 = arith.truncf %230 : vector<8x64xf32> to vector<8x64xbf16>
    %cst_148 = arith.constant dense<0.000000e+00> : vector<8x32xf32>
    %236 = tpu.matmul %235, %232, %cst_148 {dimension_numbers = #tpu.dot_dimension_numbers<[1], [0], [0], [1], [0, 0, 1, 1], [], []>} : vector<8x64xbf16>, vector<64x32xbf16>, vector<8x32xf32> -> vector<8x32xf32>
    %237 = vector.broadcast %234 : vector<1x32xf32> to vector<8x32xf32>
    %238 = arith.addf %236, %237 : vector<8x32xf32>
    %239 = arith.addf %209, %238 : vector<8x32xf32>
    %c1_149 = arith.constant 1 : index
    %c0_150 = arith.constant 0 : index
    %c0_151 = arith.constant 0 : index
    %240 = vector.load %arg12[%c1_149, %c0_150, %c0_151] : memref<2x1x32xf32, #tpu.memory_space<vmem>>, vector<1x1x32xf32>
    %241 = vector.shape_cast %240 : vector<1x1x32xf32> to vector<1x32xf32>
    %c1_152 = arith.constant 1 : index
    %c0_153 = arith.constant 0 : index
    %c0_154 = arith.constant 0 : index
    %242 = vector.load %arg13[%c1_152, %c0_153, %c0_154] : memref<2x1x32xf32, #tpu.memory_space<vmem>>, vector<1x1x32xf32>
    %243 = vector.shape_cast %242 : vector<1x1x32xf32> to vector<1x32xf32>
    %cst_155 = arith.constant dense<0.000000e+00> : vector<8xf32>
    %244 = vector.multi_reduction <add>, %239, %cst_155 [1] : vector<8x32xf32> to vector<8xf32>
    %245 = vector.shape_cast %244 : vector<8xf32> to vector<8x1xf32>
    %cst_156 = arith.constant 3.200000e+01 : f32
    %246 = vector.broadcast %cst_156 : f32 to vector<8x1xf32>
    %247 = arith.divf %245, %246 : vector<8x1xf32>
    %248 = vector.broadcast %247 : vector<8x1xf32> to vector<8x32xf32>
    %249 = arith.subf %239, %248 : vector<8x32xf32>
    %250 = arith.mulf %249, %249 : vector<8x32xf32>
    %cst_157 = arith.constant dense<0.000000e+00> : vector<8xf32>
    %251 = vector.multi_reduction <add>, %250, %cst_157 [1] : vector<8x32xf32> to vector<8xf32>
    %252 = vector.shape_cast %251 : vector<8xf32> to vector<8x1xf32>
    %cst_158 = arith.constant 3.200000e+01 : f32
    %253 = vector.broadcast %cst_158 : f32 to vector<8x1xf32>
    %254 = arith.divf %252, %253 : vector<8x1xf32>
    %255 = vector.broadcast %247 : vector<8x1xf32> to vector<8x32xf32>
    %256 = arith.subf %239, %255 : vector<8x32xf32>
    %cst_159 = arith.constant 9.99999974E-6 : f32
    %257 = vector.broadcast %cst_159 : f32 to vector<8x1xf32>
    %258 = arith.addf %254, %257 : vector<8x1xf32>
    %259 = math.rsqrt %258 : vector<8x1xf32>
    %260 = vector.broadcast %259 : vector<8x1xf32> to vector<8x32xf32>
    %261 = arith.mulf %256, %260 : vector<8x32xf32>
    %262 = vector.broadcast %241 : vector<1x32xf32> to vector<8x32xf32>
    %263 = arith.mulf %261, %262 : vector<8x32xf32>
    %264 = vector.broadcast %243 : vector<1x32xf32> to vector<8x32xf32>
    %265 = arith.addf %263, %264 : vector<8x32xf32>
    %c0_160 = arith.constant 0 : index
    %c0_161 = arith.constant 0 : index
    %266 = vector.load %arg18[%c0_160, %c0_161] : memref<32x128xbf16, #tpu.memory_space<vmem>>, vector<32x128xbf16>
    %c0_162 = arith.constant 0 : index
    %c0_163 = arith.constant 0 : index
    %267 = vector.load %arg19[%c0_162, %c0_163] : memref<1x128xf32, #tpu.memory_space<vmem>>, vector<1x128xf32>
    %268 = arith.truncf %265 : vector<8x32xf32> to vector<8x32xbf16>
    %cst_164 = arith.constant dense<0.000000e+00> : vector<8x128xf32>
    %269 = tpu.matmul %268, %266, %cst_164 {dimension_numbers = #tpu.dot_dimension_numbers<[1], [0], [0], [1], [0, 0, 1, 1], [], []>} : vector<8x32xbf16>, vector<32x128xbf16>, vector<8x128xf32> -> vector<8x128xf32>
    %270 = vector.broadcast %267 : vector<1x128xf32> to vector<8x128xf32>
    %271 = arith.addf %269, %270 : vector<8x128xf32>
    %272 = math.tanh %271 : vector<8x128xf32>
    %c0_165 = arith.constant 0 : index
    %c0_166 = arith.constant 0 : index
    %273 = vector.load %arg20[%c0_165, %c0_166] : memref<128x1xbf16, #tpu.memory_space<vmem>>, vector<128x1xbf16>
    %c0_167 = arith.constant 0 : index
    %c0_168 = arith.constant 0 : index
    %274 = vector.load %arg21[%c0_167, %c0_168] : memref<1x1xf32, #tpu.memory_space<vmem>>, vector<1x1xf32>
    %275 = arith.truncf %272 : vector<8x128xf32> to vector<8x128xbf16>
    %cst_169 = arith.constant dense<0.000000e+00> : vector<8x1xf32>
    %276 = tpu.matmul %275, %273, %cst_169 {dimension_numbers = #tpu.dot_dimension_numbers<[1], [0], [0], [1], [0, 0, 1, 1], [], []>} : vector<8x128xbf16>, vector<128x1xbf16>, vector<8x1xf32> -> vector<8x1xf32>
    %277 = vector.broadcast %274 : vector<1x1xf32> to vector<8x1xf32>
    %278 = arith.addf %276, %277 : vector<8x1xf32>
    %cst_170 = arith.constant dense<0xFF800000> : vector<1xf32>
    %279 = vector.multi_reduction <maximumf>, %278, %cst_170 [0] : vector<8x1xf32> to vector<1xf32>
    %280 = vector.shape_cast %279 : vector<1xf32> to vector<1x1xf32>
    %281 = vector.broadcast %280 : vector<1x1xf32> to vector<8x1xf32>
    %282 = arith.subf %278, %281 : vector<8x1xf32>
    %283 = math.exp %282 : vector<8x1xf32>
    %cst_171 = arith.constant dense<0.000000e+00> : vector<1xf32>
    %284 = vector.multi_reduction <add>, %283, %cst_171 [0] : vector<8x1xf32> to vector<1xf32>
    %285 = vector.shape_cast %284 : vector<1xf32> to vector<1x1xf32>
    %286 = vector.broadcast %285 : vector<1x1xf32> to vector<8x1xf32>
    %287 = arith.divf %283, %286 : vector<8x1xf32>
    %288 = vector.broadcast %287 : vector<8x1xf32> to vector<8x32xf32>
    %289 = arith.mulf %288, %265 : vector<8x32xf32>
    %cst_172 = arith.constant dense<0.000000e+00> : vector<32xf32>
    %290 = vector.multi_reduction <add>, %289, %cst_172 [0] : vector<8x32xf32> to vector<32xf32>
    %291 = vector.shape_cast %290 : vector<32xf32> to vector<1x32xf32>
    %c0_173 = arith.constant 0 : index
    %c0_174 = arith.constant 0 : index
    %292 = vector.load %arg22[%c0_173, %c0_174] : memref<32x2xbf16, #tpu.memory_space<vmem>>, vector<32x2xbf16>
    %c0_175 = arith.constant 0 : index
    %c0_176 = arith.constant 0 : index
    %293 = vector.load %arg23[%c0_175, %c0_176] : memref<1x2xf32, #tpu.memory_space<vmem>>, vector<1x2xf32>
    %294 = arith.truncf %291 : vector<1x32xf32> to vector<1x32xbf16>
    %cst_177 = arith.constant dense<0.000000e+00> : vector<1x2xf32>
    %295 = tpu.matmul %294, %292, %cst_177 {dimension_numbers = #tpu.dot_dimension_numbers<[1], [0], [0], [1], [0, 0, 1, 1], [], []>} : vector<1x32xbf16>, vector<32x2xbf16>, vector<1x2xf32> -> vector<1x2xf32>
    %296 = arith.addf %295, %293 : vector<1x2xf32>
    %c0_178 = arith.constant 0 : index
    %c0_179 = arith.constant 0 : index
    %c0_180 = arith.constant 0 : index
    %297 = vector.load %arg24[%c0_178, %c0_179, %c0_180] : memref<1x1x2xf32, #tpu.memory_space<vmem>>, vector<1x1x2xf32>
    %298 = vector.shape_cast %297 : vector<1x1x2xf32> to vector<1x2xf32>
    %299 = vector.shape_cast %296 : vector<1x2xf32> to vector<1x1x2xf32>
    tpu.vector_store %arg24[%c0_178, %c0_179, %c0_180], %299 {strides = array<i32>} : memref<1x1x2xf32, #tpu.memory_space<vmem>>, vector<1x1x2xf32>,
    return
  }
  func.func @transform_0(%arg0: i32) -> (i32, i32, i32) {
    %c0_i32 = arith.constant 0 : i32
    %c0_i32_0 = arith.constant 0 : i32
    %c0_i32_1 = arith.constant 0 : i32
    return %arg0, %c0_i32, %c0_i32_0 : i32, i32, i32
  }
  func.func @transform_1(%arg0: i32) -> (i32, i32, i32, i32) {
    %c0_i32 = arith.constant 0 : i32
    %c0_i32_0 = arith.constant 0 : i32
    %c0_i32_1 = arith.constant 0 : i32
    %c0_i32_2 = arith.constant 0 : i32
    %c0_i32_3 = arith.constant 0 : i32
    return %c0_i32, %c0_i32_0, %c0_i32_1, %c0_i32_2 : i32, i32, i32, i32
  }
  func.func @transform_2(%arg0: i32) -> (i32, i32, i32, i32) {
    %c0_i32 = arith.constant 0 : i32
    %c0_i32_0 = arith.constant 0 : i32
    %c0_i32_1 = arith.constant 0 : i32
    %c0_i32_2 = arith.constant 0 : i32
    %c0_i32_3 = arith.constant 0 : i32
    return %c0_i32, %c0_i32_0, %c0_i32_1, %c0_i32_2 : i32, i32, i32, i32
  }
  func.func @transform_3(%arg0: i32) -> (i32, i32, i32, i32) {
    %c0_i32 = arith.constant 0 : i32
    %c0_i32_0 = arith.constant 0 : i32
    %c0_i32_1 = arith.constant 0 : i32
    %c0_i32_2 = arith.constant 0 : i32
    %c0_i32_3 = arith.constant 0 : i32
    return %c0_i32, %c0_i32_0, %c0_i32_1, %c0_i32_2 : i32, i32, i32, i32
  }
  func.func @transform_4(%arg0: i32) -> (i32, i32, i32, i32) {
    %c0_i32 = arith.constant 0 : i32
    %c0_i32_0 = arith.constant 0 : i32
    %c0_i32_1 = arith.constant 0 : i32
    %c0_i32_2 = arith.constant 0 : i32
    %c0_i32_3 = arith.constant 0 : i32
    return %c0_i32, %c0_i32_0, %c0_i32_1, %c0_i32_2 : i32, i32, i32, i32
  }
  func.func @transform_5(%arg0: i32) -> (i32, i32, i32, i32) {
    %c0_i32 = arith.constant 0 : i32
    %c0_i32_0 = arith.constant 0 : i32
    %c0_i32_1 = arith.constant 0 : i32
    %c0_i32_2 = arith.constant 0 : i32
    %c0_i32_3 = arith.constant 0 : i32
    return %c0_i32, %c0_i32_0, %c0_i32_1, %c0_i32_2 : i32, i32, i32, i32
  }
  func.func @transform_6(%arg0: i32) -> (i32, i32, i32, i32) {
    %c0_i32 = arith.constant 0 : i32
    %c0_i32_0 = arith.constant 0 : i32
    %c0_i32_1 = arith.constant 0 : i32
    %c0_i32_2 = arith.constant 0 : i32
    %c0_i32_3 = arith.constant 0 : i32
    return %c0_i32, %c0_i32_0, %c0_i32_1, %c0_i32_2 : i32, i32, i32, i32
  }
  func.func @transform_7(%arg0: i32) -> (i32, i32, i32, i32) {
    %c0_i32 = arith.constant 0 : i32
    %c0_i32_0 = arith.constant 0 : i32
    %c0_i32_1 = arith.constant 0 : i32
    %c0_i32_2 = arith.constant 0 : i32
    %c0_i32_3 = arith.constant 0 : i32
    return %c0_i32, %c0_i32_0, %c0_i32_1, %c0_i32_2 : i32, i32, i32, i32
  }
  func.func @transform_8(%arg0: i32) -> (i32, i32, i32) {
    %c0_i32 = arith.constant 0 : i32
    %c0_i32_0 = arith.constant 0 : i32
    %c0_i32_1 = arith.constant 0 : i32
    %c0_i32_2 = arith.constant 0 : i32
    return %c0_i32, %c0_i32_0, %c0_i32_1 : i32, i32, i32
  }
  func.func @transform_9(%arg0: i32) -> (i32, i32, i32) {
    %c0_i32 = arith.constant 0 : i32
    %c0_i32_0 = arith.constant 0 : i32
    %c0_i32_1 = arith.constant 0 : i32
    %c0_i32_2 = arith.constant 0 : i32
    return %c0_i32, %c0_i32_0, %c0_i32_1 : i32, i32, i32
  }
  func.func @transform_10(%arg0: i32) -> (i32, i32, i32) {
    %c0_i32 = arith.constant 0 : i32
    %c0_i32_0 = arith.constant 0 : i32
    %c0_i32_1 = arith.constant 0 : i32
    %c0_i32_2 = arith.constant 0 : i32
    return %c0_i32, %c0_i32_0, %c0_i32_1 : i32, i32, i32
  }
  func.func @transform_11(%arg0: i32) -> (i32, i32, i32) {
    %c0_i32 = arith.constant 0 : i32
    %c0_i32_0 = arith.constant 0 : i32
    %c0_i32_1 = arith.constant 0 : i32
    %c0_i32_2 = arith.constant 0 : i32
    return %c0_i32, %c0_i32_0, %c0_i32_1 : i32, i32, i32
  }
  func.func @transform_12(%arg0: i32) -> (i32, i32, i32) {
    %c0_i32 = arith.constant 0 : i32
    %c0_i32_0 = arith.constant 0 : i32
    %c0_i32_1 = arith.constant 0 : i32
    %c0_i32_2 = arith.constant 0 : i32
    return %c0_i32, %c0_i32_0, %c0_i32_1 : i32, i32, i32
  }
  func.func @transform_13(%arg0: i32) -> (i32, i32, i32) {
    %c0_i32 = arith.constant 0 : i32
    %c0_i32_0 = arith.constant 0 : i32
    %c0_i32_1 = arith.constant 0 : i32
    %c0_i32_2 = arith.constant 0 : i32
    return %c0_i32, %c0_i32_0, %c0_i32_1 : i32, i32, i32
  }
  func.func @transform_14(%arg0: i32) -> (i32, i32, i32) {
    %c0_i32 = arith.constant 0 : i32
    %c0_i32_0 = arith.constant 0 : i32
    %c0_i32_1 = arith.constant 0 : i32
    %c0_i32_2 = arith.constant 0 : i32
    return %c0_i32, %c0_i32_0, %c0_i32_1 : i32, i32, i32
  }
  func.func @transform_15(%arg0: i32) -> (i32, i32, i32) {
    %c0_i32 = arith.constant 0 : i32
    %c0_i32_0 = arith.constant 0 : i32
    %c0_i32_1 = arith.constant 0 : i32
    %c0_i32_2 = arith.constant 0 : i32
    return %c0_i32, %c0_i32_0, %c0_i32_1 : i32, i32, i32
  }
  func.func @transform_16(%arg0: i32) -> (i32, i32, i32) {
    %c0_i32 = arith.constant 0 : i32
    %c0_i32_0 = arith.constant 0 : i32
    %c0_i32_1 = arith.constant 0 : i32
    %c0_i32_2 = arith.constant 0 : i32
    return %c0_i32, %c0_i32_0, %c0_i32_1 : i32, i32, i32
  }
  func.func @transform_17(%arg0: i32) -> (i32, i32) {
    %c0_i32 = arith.constant 0 : i32
    %c0_i32_0 = arith.constant 0 : i32
    %c0_i32_1 = arith.constant 0 : i32
    return %c0_i32, %c0_i32_0 : i32, i32
  }
  func.func @transform_18(%arg0: i32) -> (i32, i32) {
    %c0_i32 = arith.constant 0 : i32
    %c0_i32_0 = arith.constant 0 : i32
    %c0_i32_1 = arith.constant 0 : i32
    return %c0_i32, %c0_i32_0 : i32, i32
  }
  func.func @transform_19(%arg0: i32) -> (i32, i32) {
    %c0_i32 = arith.constant 0 : i32
    %c0_i32_0 = arith.constant 0 : i32
    %c0_i32_1 = arith.constant 0 : i32
    return %c0_i32, %c0_i32_0 : i32, i32
  }
  func.func @transform_20(%arg0: i32) -> (i32, i32) {
    %c0_i32 = arith.constant 0 : i32
    %c0_i32_0 = arith.constant 0 : i32
    %c0_i32_1 = arith.constant 0 : i32
    return %c0_i32, %c0_i32_0 : i32, i32
  }
  func.func @transform_21(%arg0: i32) -> (i32, i32) {
    %c0_i32 = arith.constant 0 : i32
    %c0_i32_0 = arith.constant 0 : i32
    %c0_i32_1 = arith.constant 0 : i32
    return %c0_i32, %c0_i32_0 : i32, i32
  }
  func.func @transform_22(%arg0: i32) -> (i32, i32) {
    %c0_i32 = arith.constant 0 : i32
    %c0_i32_0 = arith.constant 0 : i32
    %c0_i32_1 = arith.constant 0 : i32
    return %c0_i32, %c0_i32_0 : i32, i32
  }
  func.func @transform_23(%arg0: i32) -> (i32, i32, i32) {
    %c0_i32 = arith.constant 0 : i32
    %c0_i32_0 = arith.constant 0 : i32
    %c0_i32_1 = arith.constant 0 : i32
    return %arg0, %c0_i32, %c0_i32_0 : i32, i32, i32
  }
}

</mosaic_0001>

<bundles_post_ra>
// kernel: tpu_custom_call.1
= control target key start
LH: loop header
LB: loop body
LE: loop exit
PB: predicated region body
PF: predicated region fallthrough
CT: control target
= control target key end

     0   :  { %s4286_s0 = inlined_call_operand.vmem [shape: f32[2,8,32], index: 0, kind: input, shape index: {}]   ;;  %s4287_s1 = inlined_call_operand.vmem [shape: bf16[2,4,32,8], index: 1, kind: input, shape index: {}]   ;;  %s4288_s2 = inlined_call_operand.vmem [shape: f32[2,4,1,8], index: 2, kind: input, shape index: {}]   ;;  %s4289_s3 = inlined_call_operand.vmem [shape: bf16[2,4,32,8], index: 3, kind: input, shape index: {}]   ;;  %s4290_s4 = inlined_call_operand.vmem [shape: f32[2,4,1,8], index: 4, kind: input, shape index: {}]   ;;  %s4291_s5 = inlined_call_operand.vmem [shape: bf16[2,4,32,8], index: 5, kind: input, shape index: {}]   ;;  %s4292_s6 = inlined_call_operand.vmem [shape: f32[2,4,1,8], index: 6, kind: input, shape index: {}]   ;;  %s4293_s7 = inlined_call_operand.vmem [shape: bf16[2,4,8,32], index: 7, kind: input, shape index: {}]   ;;  %s4294_s8 = inlined_call_operand.vmem [shape: f32[2,1,32], index: 8, kind: input, shape index: {}]   ;;  %s4295_s9 = inlined_call_operand.vmem [shape: f32[2,1,32], index: 9, kind: input, shape index: {}]   ;;  %s4296_s10 = inlined_call_operand.vmem [shape: f32[2,1,32], index: 10, kind: input, shape index: {}]   ;;  %s4297_s11 = inlined_call_operand.vmem [shape: f32[2,1,32], index: 11, kind: input, shape index: {}]   ;;  %s4298_s12 = inlined_call_operand.vmem [shape: f32[2,1,32], index: 12, kind: input, shape index: {}]   ;;  %s4299_s13 = inlined_call_operand.vmem [shape: bf16[2,32,64], index: 13, kind: input, shape index: {}]   ;;  %s4300_s14 = inlined_call_operand.vmem [shape: f32[2,1,64], index: 14, kind: input, shape index: {}]   ;;  %s4301_s15 = inlined_call_operand.vmem [shape: bf16[2,64,32], index: 15, kind: input, shape index: {}]   ;;  %s4302_s16 = inlined_call_operand.vmem [shape: f32[2,1,32], index: 16, kind: input, shape index: {}]   ;;  %s4303_s17 = inlined_call_operand.vmem [shape: bf16[32,128], index: 17, kind: input, shape index: {}]   ;;  %s4304_s18 = inlined_call_operand.vmem [shape: f32[1,128], index: 18, kind: input, shape index: {}]   ;;  %s4305_s19 = inlined_call_operand.vmem [shape: bf16[128,1], index: 19, kind: input, shape index: {}]   ;;  %s4306_s20 = inlined_call_operand.<no memory space> [shape: f32[1,1], index: 20, kind: input, shape index: {}]   ;;  %s4307_s21 = inlined_call_operand.vmem [shape: bf16[32,2], index: 21, kind: input, shape index: {}]   ;;  %s4308_s22 = inlined_call_operand.vmem [shape: f32[1,2], index: 22, kind: input, shape index: {}]   ;;  %s4309_s23 = inlined_call_operand.hbm [shape: f32[2,1,2], index: 23, kind: output, shape index: {}]  }
   0x1   :  { %4331 = sst [smem:[#allocation14_spill]] %s4286_s0  ;;  %v28_v0 = vstv %s4306_s20 }
   0x2   :  { %4332 = sst [smem:[#allocation15_spill]] %s4287_s1  ;;  %29 = vst [vmem:[#allocation2] sm:$0x1] %v28_v0 }
   0x3   :  { %4333 = sst [smem:[#allocation16_spill]] %s4288_s2 }
   0x4   :  { %4334 = sst [smem:[#allocation17_spill]] %s4289_s3 }
   0x5   :  { %4335 = sst [smem:[#allocation18_spill]] %s4290_s4 }
   0x6   :  { %4336 = sst [smem:[#allocation19_spill]] %s4291_s5 }
   0x7   :  { %4337 = sst [smem:[#allocation20_spill]] %s4292_s6 }
   0x8   :  { %4338 = sst [smem:[#allocation21_spill]] %s4293_s7 }
   0x9   :  { %4339 = sst [smem:[#allocation22_spill]] %s4294_s8 }
   0xa   :  { %4340 = sst [smem:[#allocation23_spill]] %s4295_s9 }
   0xb   :  { %4341 = sst [smem:[#allocation24_spill]] %s4296_s10 }
   0xc   :  { %4342 = sst [smem:[#allocation25_spill]] %s4308_s22 }
   0xd   :  { %4343 = sst [smem:[#allocation26_spill]] %s4309_s23 }
   0xe   :  { %30 = vsyncpa [#allocation4], 0 }
   0xf   :  { %32 = vsyncpa [#allocation4 + $0x1], 0  ;;  %s3683_s24 = smov 0   ;;  %s3685_s25 = smov 0  }
  0x10   :  { %s3687_s5 = smov 0   ;;  %s3689_s1 = smov 0  }
  0x11 LB: > { %4344 = sst [smem:[#allocation6_spill]] %s3544_s24  ;;  %s3704_s20 = sadd.s32 4294967295, %s3556_s1   ;;  %s3556_s1 = sphi %s3689_s1, %s4373_s1   ;;  %s3552_s5 = sphi %s3687_s5, %s4375_s5   ;;  %s3548_s25 = sphi %s3685_s25, %s4377_s25   ;;  %s3544_s24 = sphi %s3683_s24, %s4376_s24  }
  0x12   : > { %4345 = sst [smem:[#allocation7_spill]] %s3552_s5  ;;  %s2856_s26 = sadd.s32 4294967294, %s3556_s1  }
  0x13   : > { %4346 = sst [smem:[#allocation8_spill]] %s3556_s1  ;;  %s3708_s2 = sadd.s32 1, %s3556_s1  }
  0x14   : > { %4347 = sst [smem:[#allocation9_spill]] %s3704_s20  ;;  %s533_s6 = sadd.s32 1, %s3552_s5 }
  0x15   : > { %4348 = sst [smem:[#allocation10_spill]] %s3708_s2  ;;  %s530_s27 = ssub.s32 %s3556_s1, %s3708_s2 }
  0x16   : > { %p543_p0 = scmp.ne.s32.totalorder %s3552_s5, %s3548_s25  ;;  %p531_p1 = scmp.eq.s32.totalorder %s530_s27, 0 }
  0x17   : > { %p544_p2 = scmp.eq.s32.totalorder %s3704_s20, 1  ;;  %p549_p3 = scmp.ne.s32.totalorder %s3548_s25, %s3544_s24 }
  0x18   : > { %p550_p4 = scmp.eq.s32.totalorder %s2856_s26, 1  ;;  %p2859_p7 = scmp.ge.s32.totalorder %s3556_s1, 1 }
  0x19   : > { %s3719_s7 = scalar_select %p531_p1, %s3552_s5, %s533_s6  }
  0x1a   : > { %p3721_p5 = por %p544_p2, %p543_p0  ;;  %p3725_p6 = por %p550_p4, %p549_p3 }
  0x1b   : > { %4349 = sst [smem:[#allocation11_spill]] %s3719_s7  ;;  %p641_p8 = scmp.lt.s32.totalorder %s3556_s1, 3 }
  0x1c   : > { %s4350_s28 = scalar_select %p3721_p5, 1, 0 }
  0x1d   : > { %s4352_s29 = scalar_select %p3725_p6, 1, 0 }
  0x1e   : > { %4351 = sst [smem:[#allocation12_spill]] %s4350_s28  ;;  %p642_p9 = pnand %p2859_p7, %p641_p8 }
  0x1f   : > { %4353 = sst [smem:[#allocation13_spill]] %s4352_s29  ;;  %p703_p10 = scmp.lt.s32.totalorder (!%p642_p9), %s3704_s20, 1 }
  0x20   : > { %645 = sbr.rel (%p642_p9) target bundleno = 3980 (0xf8c), region = 112  ;;  %s4354_s4 = sld [smem:[#allocation15_spill]] (!%p642_p9) }
  0x21   : > { %s4355_s2 = sld [smem:[#allocation17_spill]] (!%p642_p9)  ;;  %s701_s24 = sand.u32 (!%p642_p9), 1, %s3548_s25  }
  0x22   : > { %s4356_s22 = sld [smem:[#allocation14_spill]] (!%p642_p9) }
  0x23   : > { %s4357_s29 = sld [smem:[#allocation19_spill]] (!%p642_p9) }
  0x24   : > { %s4359_s6 = sld [smem:[#allocation16_spill]] (!%p642_p9) }
  0x25   : > { %s704_s30 = scalar_select %p703_p10, %s3704_s20, 1  ;;  %vm754_vm0 = vcmask 261120   ;;  %vm1118_vm1 = vcmask 64512   ;;  %vm1302_vm2 = vcmask 1043456  }
  0x26   : > { %v3289_v1 = vld [vmem:[%s4354_s4 + $0x8] sm:$0xff]  ;;  %v3291_v2 = vld [vmem:[%s4354_s4 + $0x18] sm:$0xff]  ;;  %v3288_v5 = vld [vmem:[%s4354_s4] sm:$0xff]  ;;  %s4360_s3 = sld [smem:[#allocation20_spill]] }
  0x27   : > { %v3293_v3 = vld [vmem:[%s4354_s4 + $0x28] sm:$0xff]  ;;  %v3299_v4 = vld [vmem:[%s4355_s2 + $0x18] sm:$0xff]  ;;  %764 = vmatpush.bf16.msra.mxu0 %v3289_v1  ;;  %789 = vmatpush.bf16.msra.mxu3 %v3291_v2  ;;  %v3290_v6 = vld [vmem:[%s4354_s4 + $0x10] sm:$0xff]  ;;  %s2860_s7 = sshll.u32 %s704_s30, 3  ;;  %s4358_s30 = sld [smem:[#allocation18_spill]] }
  0x28   : > { %814 = vmatpush.bf16.msra.mxu2 %v3293_v3  ;;  %921 = vmatpush.bf16.msra.mxu1 %v3299_v4  ;;  %v3292_v7 = vld [vmem:[%s4354_s4 + $0x20] sm:$0xff]  ;;  %v3298_v8 = vld [vmem:[%s4355_s2 + $0x10] sm:$0xff]  ;;  %v3295_v9 = vld [vmem:[%s4354_s4 + $0x38] sm:$0xff]  ;;  %s706_s23 = scalar_lea.vmem %s4356_s22, %s2860_s7  ;;  %s4361_s22 = sld [smem:[#allocation21_spill]] }
  0x29   : > { %v3297_v10 = vld [vmem:[%s4355_s2 + $0x8] sm:$0xff]  ;;  %v3769_v12 = vld [vmem:[%s706_s23] sm:$0xff]  ;;  %v3294_v13 = vld [vmem:[%s4354_s4 + $0x30] sm:$0xff]  ;;  %s4362_s8 = sld [smem:[#allocation22_spill]] }
  0x2a   : > { %v3301_v11 = vld [vmem:[%s4355_s2 + $0x28] sm:$0xff]  ;;  %v3296_v14 = vld [vmem:[%s4355_s2] sm:$0xff]  ;;  %v709_v15 = vpack.c.bf16 %v3769_v12, %v3769_v12  ;;  %v3303_v17 = vld [vmem:[%s4355_s2 + $0x38] sm:$0xff]  ;;  %s4363_s9 = sld [smem:[#allocation23_spill]] }
  0x2b   : > { %765 = vmatpush.bf16.msra.mxu0 %v3288_v5  ;;  %790 = vmatpush.bf16.msra.mxu3 %v3290_v6  ;;  %v3300_v16 = vld [vmem:[%s4355_s2 + $0x20] sm:$0xff]  ;;  %v3307_v18 = vld [vmem:[%s4357_s29 + $0x18] sm:$0xff]  ;;  %v3306_v19 = vld [vmem:[%s4357_s29 + $0x10] sm:$0xff]  ;;  %s4364_s10 = sld [smem:[#allocation24_spill]] }
  0x2c   : > { %815 = vmatpush.bf16.msra.mxu2 %v3292_v7  ;;  %922 = vmatpush.bf16.msra.mxu1 %v3298_v8  ;;  %v3302_v20 = vld [vmem:[%s4355_s2 + $0x30] sm:$0xff]  ;;  %v3305_v21 = vld [vmem:[%s4357_s29 + $0x8] sm:$0xff]  ;;  %v3304_v22 = vld [vmem:[%s4357_s29] sm:$0xff]  ;;  %s4365_s27 = sld [smem:[#allocation9_spill]] }
  0x2d   : > { %v3309_v23 = vld [vmem:[%s4357_s29 + $0x28] sm:$0xff]  ;;  %v3308_v24 = vld [vmem:[%s4357_s29 + $0x20] sm:$0xff]  ;;  %v3311_v25 = vld [vmem:[%s4357_s29 + $0x38] sm:$0xff]  ;;  %s4366_s1 = sld [smem:[#allocation26_spill]] }
  0x2e   : > { %2869 = vmatmul.msk.bf16.vlgmr.msra.gmra.mxu0 %vm754_vm0, %v709_v15  ;;  %2878 = vmatmul.msk.bf16.vlgmr.msra.gmra.mxu3 %vm754_vm0, %v709_v15  ;;  %v3310_v26 = vld [vmem:[%s4357_s29 + $0x30] sm:$0xff]  ;;  %v3403_v27 = vld [vmem:[%s4358_s30 + $0x1] ss:$0 sm:$0xff]  ;;  %v3406_v40 = vld [vmem:[%s4358_s30] ss:$0 sm:$0xff]  ;;  %s4368_s7 = sld [smem:[#allocation25_spill]] }
  0x2f   : > { %839 = vmatpush.bf16.msrb.mxu3 %v3295_v9  ;;  %896 = vmatpush.bf16.msrb.mxu0 %v3297_v10  ;;  %v3404_v32 = vld [vmem:[%s4359_s6 + $0x1] ss:$0 sm:$0xff]  ;;  %v3402_v44 = vld [vmem:[%s4359_s6] ss:$0 sm:$0xff]  ;;  %v3408_v49 = vld [vmem:[%s4358_s30 + $0x2] ss:$0 sm:$0xff] }
  0x30   : > { %2887 = vmatmul.msk.bf16.vlgmr.msra.gmra.mxu2 %vm754_vm0, %v709_v15  ;;  %2914 = vmatmul.msk.bf16.vlgmr.msra.gmra.mxu1 %vm754_vm0, %v709_v15  ;;  %v3410_v47 = vld [vmem:[%s4360_s3 + $0x1] ss:$0 sm:$0xff]  ;;  %v3405_v60 = vld [vmem:[%s4359_s6 + $0x2] ss:$0 sm:$0xff]  ;;  %v3409_v4 = vld [vmem:[%s4358_s30 + $0x3] ss:$0 sm:$0xff] }
  0x31   : > { %946 = vmatpush.bf16.msrb.mxu2 %v3301_v11  ;;  %1053 = vmatpush.bf16.msrb.mxu1 %v3307_v18  ;;  %v3407_v7 = vld [vmem:[%s4359_s6 + $0x3] ss:$0 sm:$0xff] }
  0x33   : > { %840 = vmatpush.bf16.msrb.mxu3 %v3294_v13  ;;  %897 = vmatpush.bf16.msrb.mxu0 %v3296_v14  ;;  %v3411_v14 = vld [vmem:[%s4360_s3] ss:$0 sm:$0xff]  ;;  %s4367_s28 = smov %s4366_s1  ;;  %s2797_s23 = scalar_lea.hbm %s4366_s1, %s4365_s27 }
  0x34   : > { %s3514_s26 = scalar_lea.hbm %s4367_s28, 2 }
  0x35   : > { %947 = vmatpush.bf16.msrb.mxu2 %v3300_v16  ;;  %1054 = vmatpush.bf16.msrb.mxu1 %v3306_v19 }
  0x37   : > { %971 = vmatpush.bf16.msra.mxu3 %v3303_v17  ;;  %1028 = vmatpush.bf16.msra.mxu0 %v3305_v21 }
  0x39   : > { %1078 = vmatpush.bf16.msra.mxu2 %v3309_v23 }
  0x3b   : > { %972 = vmatpush.bf16.msra.mxu3 %v3302_v20  ;;  %1029 = vmatpush.bf16.msra.mxu0 %v3304_v22  ;;  %v3412_v20 = vld [vmem:[%s4360_s3 + $0x2] ss:$0 sm:$0xff] }
  0x3d   : > { %1079 = vmatpush.bf16.msra.mxu2 %v3308_v24 }
  0x3e   : > { %2896 = vmatmul.msk.bf16.vlgmr.msrb.gmra.mxu3 %vm754_vm0, %v709_v15  ;;  %2905 = vmatmul.msk.bf16.vlgmr.msrb.gmra.mxu0 %vm754_vm0, %v709_v15 }
  0x3f   : > { %1103 = vmatpush.bf16.msrb.mxu3 %v3311_v25  ;;  %v3413_v25 = vld [vmem:[%s4360_s3 + $0x3] ss:$0 sm:$0xff] }
  0x40   : > { %2923 = vmatmul.msk.bf16.vlgmr.msrb.gmra.mxu2 %vm754_vm0, %v709_v15  ;;  %2950 = vmatmul.msk.bf16.vlgmr.msrb.gmra.mxu1 %vm754_vm0, %v709_v15 }
  0x43   : > { %1104 = vmatpush.bf16.msrb.mxu3 %v3310_v26 }
  0x4e   : > { %2932 = vmatmul.msk.bf16.vlgmr.msra.gmra.mxu3 %vm754_vm0, %v709_v15  ;;  %2941 = vmatmul.msk.bf16.vlgmr.msra.gmra.mxu0 %vm754_vm0, %v709_v15 }
  0x50   : > { %2959 = vmatmul.msk.bf16.vlgmr.msra.gmra.mxu2 %vm754_vm0, %v709_v15 }
  0x5e   : > { %2968 = vmatmul.msk.bf16.vlgmr.msrb.gmra.mxu3 %vm754_vm0, %v709_v15 }
  0xab   : > { %v767_v28 = vpop.f32.mrf.mxu0 }
  0xac   : > { %v768_v50 = vadd.f32 %v3402_v44, %v767_v28 }
  0xad   : > { %v924_v29 = vpop.f32.mrf.mxu1 }
  0xae   : > { %v925_v30 = vadd.f32 %v3403_v27, %v924_v29  ;;  %v1110_v58 = vpack.c.bf16 %v768_v50, %v768_v50 }
  0xb0   : > { %v1115_v31 = vpack.c.bf16 %v925_v30, %v925_v30 }
  0xb1   : > { %v792_v34 = vpop.f32.mrf.mxu3 }
  0xb2   : > { %v1142_v33 = vsel %vm1118_vm1, %v1115_v31, 0  ;;  %v793_v36 = vadd.f32 %v3404_v32, %v792_v34 }
  0xb3   : > { %v817_v35 = vpop.f32.mrf.mxu2  ;;  %1151 = vmatpush.bf16.xpose.msra.mxu1 %v1142_v33  ;;  %v769_v37 = vpop.f32.mrf.mxu0 }
  0xb4   : > { %v1111_v39 = vpack.c.bf16 %v793_v36, %v793_v36  ;;  %v818_v0 = vadd.f32 %v3405_v60, %v817_v35 }
  0xb5   : > { %v926_v38 = vpop.f32.mrf.mxu1 }
  0xb6   : > { %v1112_v3 = vpack.c.bf16 %v818_v0, %v818_v0 }
  0xb9   : > { %v794_v41 = vpop.f32.mrf.mxu3 }
  0xba   : > { %2970 = vmatmul.msk.bf16.vlgmr.msra.gmra.mxu1 %vm1118_vm1, %v1111_v39 }
  0xbb   : > { %v819_v42 = vpop.f32.mrf.mxu2  ;;  %v899_v43 = vpop.f32.mrf.mxu0 }
  0xbc   : > { %v900_v45 = vadd.f32 %v3406_v40, %v899_v43 }
  0xbd   : > { %v1056_v48 = vpop.f32.mrf.mxu1 }
  0xbe   : > { %v1114_v46 = vpack.c.bf16 %v900_v45, %v900_v45  ;;  %v1057_v52 = vadd.f32 %v3410_v47, %v1056_v48 }
  0xc0   : > { %v1123_v51 = vsel %vm1118_vm1, %v1114_v46, 0  ;;  %v1296_v55 = vpack.c.bf16 %v1057_v52, %v1057_v52 }
  0xc1   : > { %v842_v53 = vpop.f32.mrf.mxu3  ;;  %1132 = vmatpush.bf16.xpose.msrb.mxu0 %v1123_v51 }
  0xc2   : > { %v1323_v59 = vsel %vm1302_vm2, %v1296_v55, 0  ;;  %v843_v10 = vadd.f32 %v3407_v7, %v842_v53 }
  0xc3   : > { %v949_v54 = vpop.f32.mrf.mxu2  ;;  %v901_v57 = vpop.f32.mrf.mxu0  ;;  %1332 = vmatpush.bf16.msrb.mxu1 %v1323_v59 }
  0xc4   : > { %v950_v56 = vadd.f32 %v3408_v49, %v949_v54  ;;  %v1113_v13 = vpack.c.bf16 %v843_v10, %v843_v10 }
  0xc5   : > { %v1058_v62 = vpop.f32.mrf.mxu1 }
  0xc6   : > { %v1116_v61 = vpack.c.bf16 %v950_v56, %v950_v56 }
  0xc8   : > { %v1161_v63 = vsel %vm1118_vm1, %v1116_v61, 0  ;;  %2969 = vmatmul.msk.bf16.vlgmr.msrb.gmra.mxu0 %vm1118_vm1, %v1110_v58 }
  0xc9   : > { %1170 = vmatpush.bf16.xpose.msrb.mxu2 %v1161_v63  ;;  %v844_v1 = vpop.f32.mrf.mxu3 }
  0xcb   : > { %v951_v2 = vpop.f32.mrf.mxu2  ;;  %v1031_v15 = vpop.f32.mrf.mxu0 }
  0xcc   : > { %v1032_v16 = vadd.f32 %v3411_v14, %v1031_v15 }
  0xce   : > { %v1295_v17 = vpack.c.bf16 %v1032_v16, %v1032_v16 }
  0xd0   : > { %2971 = vmatmul.msk.bf16.vlgmr.msrb.gmra.mxu2 %vm1118_vm1, %v1112_v3  ;;  %v1304_v18 = vsel %vm1302_vm2, %v1295_v17, 0 }
  0xd1   : > { %v974_v5 = vpop.f32.mrf.mxu3  ;;  %1313 = vmatpush.bf16.msra.mxu0 %v1304_v18 }
  0xd2   : > { %v975_v6 = vadd.f32 %v3409_v4, %v974_v5 }
  0xd3   : > { %v1033_v19 = vpop.f32.mrf.mxu0  ;;  %v1081_v21 = vpop.f32.mrf.mxu2 }
  0xd4   : > { %v1117_v8 = vpack.c.bf16 %v975_v6, %v975_v6  ;;  %v1082_v22 = vadd.f32 %v3412_v20, %v1081_v21 }
  0xd6   : > { %v1180_v9 = vsel %vm1118_vm1, %v1117_v8, 0  ;;  %v1297_v23 = vpack.c.bf16 %v1082_v22, %v1082_v22 }
  0xd7   : > { %1189 = vmatpush.bf16.xpose.msra.mxu3 %v1180_v9 }
  0xd8   : > { %v1342_v24 = vsel %vm1302_vm2, %v1297_v23, 0 }
  0xd9   : > { %v976_v11 = vpop.f32.mrf.mxu3  ;;  %1351 = vmatpush.bf16.msra.mxu2 %v1342_v24 }
  0xdb   : > { %v1083_v26 = vpop.f32.mrf.mxu2 }
  0xde   : > { %2972 = vmatmul.msk.bf16.vlgmr.msra.gmra.mxu3 %vm1118_vm1, %v1113_v13 }
  0xe1   : > { %v1106_v27 = vpop.f32.mrf.mxu3 }
  0xe2   : > { %v1107_v28 = vadd.f32 %v3413_v25, %v1106_v27 }
  0xe4   : > { %v1298_v29 = vpack.c.bf16 %v1107_v28, %v1107_v28 }
  0xe6   : > { %v1361_v30 = vsel %vm1302_vm2, %v1298_v29, 0 }
  0xe7   : > { %1370 = vmatpush.bf16.msrb.mxu3 %v1361_v30 }
  0xe9   : > { %v1108_v31 = vpop.f32.mrf.mxu3 }
 0x137   : > { %v1153_v32 = vpop.f32.mrf.mxu1 }
 0x138   : > { %v1198_v37 = vsel %vm1118_vm1, %v1153_v32, -inf }
 0x13f   : > { %v1155_v33 = vpop.f32.mrf.mxu1 }
 0x145   : > { %v1134_v34 = vpop.f32.mrf.mxu0 }
 0x146   : > { %v1195_v35 = vsel %vm1118_vm1, %v1134_v34, -inf }
 0x147   : > { %1196 = vmax.xlane.f32.xlu1 %v1195_v35 }
 0x14d   : > { %v1136_v36 = vpop.f32.mrf.mxu0 }
 0x14f   : > { %1199 = vmax.xlane.f32.xlu1 %v1198_v37 }
 0x153   : > { %v1172_v38 = vpop.f32.mrf.mxu2 }
 0x154   : > { %v1201_v39 = vsel %vm1118_vm1, %v1172_v38, -inf }
 0x155   : > { %1202 = vmax.xlane.f32.xlu0 %v1201_v39 }
 0x15b   : > { %v1174_v40 = vpop.f32.mrf.mxu2 }
 0x161   : > { %v1191_v41 = vpop.f32.mrf.mxu3 }
 0x162   : > { %v1204_v42 = vsel %vm1118_vm1, %v1191_v41, -inf }
 0x163   : > { %1205 = vmax.xlane.f32.xlu0 %v1204_v42 }
 0x169   : > { %v1193_v43 = vpop.f32.mrf.mxu3 }
 0x1ba   : > { %v1197_v44 = vpop.xlane.xlu1 %1196 }
 0x1bb   : > { %v1207_v45 = vsub.f32 %v1134_v34, %v1197_v44 }
 0x1bd   : > { %v1211_v46 = vmul.f32 1.442695, %v1207_v45 }
 0x1bf   : > { %3442 = vpow2.f32 %v1211_v46 }
 0x1c2   : > { %v1200_v47 = vpop.xlane.xlu1 %1199 }
 0x1c3   : > { %v1208_v48 = vsub.f32 %v1153_v32, %v1200_v47 }
 0x1c5   : > { %v3443_v49 = vpop.eup %3442  ;;  %v1213_v50 = vmul.f32 1.442695, %v1208_v48 }
 0x1c6   : > { %v1219_v51 = vsel %vm1118_vm1, %v3443_v49, 0.0 }
 0x1c7   : > { %3444 = vpow2.f32 %v1213_v50  ;;  %1220 = vadd.xlane.f32.xlu0 %v1219_v51 }
 0x1c8   : > { %v1203_v52 = vpop.xlane.xlu0 %1202 }
 0x1c9   : > { %v1209_v53 = vsub.f32 %v1172_v38, %v1203_v52 }
 0x1cb   : > { %v1215_v54 = vmul.f32 1.442695, %v1209_v53  ;;  %v1380_v53 = vld [vmem:[%s4361_s22] sm:$0xf] }
 0x1cd   : > { %3446 = vpow2.f32 %v1215_v54  ;;  %v3445_v55 = vpop.eup %3444  ;;  %v1388_v54 = vsel %vm1302_vm2, %v1380_v53, 0  ;;  %v3416_v53 = vld [vmem:[%s4364_s10] ss:$0 sm:$0xff] }
 0x1ce   : > { %v1222_v56 = vsel %vm1118_vm1, %v3445_v55, 0.0  ;;  %1397 = vmatpush.bf16.msrb.mxu0 %v1388_v54 }
 0x1cf   : > { %1223 = vadd.xlane.f32.xlu1 %v1222_v56 }
 0x1d3   : > { %v3878_v57 = vpop.eup %3446 }
 0x1d4   : > { %v1225_v58 = vsel %vm1118_vm1, %v3878_v57, 0.0 }
 0x1d5   : > { %1226 = vadd.xlane.f32.xlu2 %v1225_v58 }
 0x1d6   : > { %v1206_v59 = vpop.xlane.xlu0 %1205 }
 0x1d7   : > { %v1210_v60 = vsub.f32 %v1191_v41, %v1206_v59  ;;  %v1383_v59 = vld [vmem:[%s4361_s22 + $0xc] sm:$0xf] }
 0x1d9   : > { %v1217_v61 = vmul.f32 1.442695, %v1210_v60  ;;  %v1445_v60 = vsel %vm1302_vm2, %v1383_v59, 0  ;;  %v3316_v59 = vld [vmem:[%s4301_s15 + $0x10] sm:$0xff] }
 0x1da   : > { %1454 = vmatpush.bf16.msra.mxu3 %v1445_v60  ;;  %v3315_v60 = vld [vmem:[%s4301_s15 + $0x8] sm:$0xff] }
 0x1db   : > { %3448 = vpow2.f32 %v1217_v61 }
 0x1e1   : > { %v3882_v62 = vpop.eup %3448 }
 0x1e2   : > { %v1228_v63 = vsel %vm1118_vm1, %v3882_v62, 0.0 }
 0x1e3   : > { %1229 = vadd.xlane.f32.xlu2 %v1228_v63 }
 0x23a   : > { %v1221_v0 = vpop.xlane.xlu0 %1220 }
 0x23b   : > { %3450 = vrcp.f32 %v1221_v0  ;;  %v1242_v5 = vand.u32 2147483648, %v1221_v0  ;;  %v1240_v7 = vand.u32 2147483647, %v1221_v0  ;;  %vm1236_vm4 = vweird.f32 %v1221_v0 }
 0x23d   : > { %v1243_v11 = vor.u32 1.1754944e-38, %v1242_v5  ;;  %vm1241_vm6 = vcmp.eq.f32.partialorder %v1240_v7, 8.507059e+37 }
 0x241   : > { %v3451_v1 = vpop.eup %3450 }
 0x242   : > { %v1232_v2 = vmul.f32 %v3451_v1, %v1221_v0  ;;  %v1224_v3 = vpop.xlane.xlu1 %1223  ;;  %vm1237_vm3 = vweird.f32 %v3451_v1 }
 0x243   : > { %3452 = vrcp.f32 %v1224_v3  ;;  %vm1238_vm5 = vmor %vm1236_vm4, %vm1237_vm3  ;;  %v1257_v18 = vand.u32 2147483648, %v1224_v3  ;;  %v1255_v21 = vand.u32 2147483647, %v1224_v3  ;;  %vm1251_vm8 = vweird.f32 %v1224_v3 }
 0x244   : > { %v1233_v4 = vsub.f32 1.0, %v1232_v2 }
 0x245   : > { %v1258_v25 = vor.u32 1.1754944e-38, %v1257_v18  ;;  %vm1256_vm10 = vcmp.eq.f32.partialorder %v1255_v21, 8.507059e+37 }
 0x246   : > { %v1234_v6 = vmul.f32 %v3451_v1, %v1233_v4 }
 0x248   : > { %v1227_v8 = vpop.xlane.xlu2 %1226  ;;  %v1235_v9 = vadd.f32 %v3451_v1, %v1234_v6 }
 0x249   : > { %3454 = vrcp.f32 %v1227_v8  ;;  %v3453_v10 = vpop.eup %3452  ;;  %v1272_v28 = vand.u32 2147483648, %v1227_v8  ;;  %v1270_v31 = vand.u32 2147483647, %v1227_v8  ;;  %vm1266_vm12 = vweird.f32 %v1227_v8 }
 0x24a   : > { %v1239_v13 = vsel %vm1238_vm5, %v3451_v1, %v1235_v9  ;;  %v1247_v14 = vmul.f32 %v3453_v10, %v1224_v3  ;;  %vm1252_vm7 = vweird.f32 %v3453_v10 }
 0x24b   : > { %v1244_v15 = vsel %vm1241_vm6, %v1243_v11, %v1239_v13  ;;  %vm1253_vm9 = vmor %vm1251_vm8, %vm1252_vm7  ;;  %v1273_v34 = vor.u32 1.1754944e-38, %v1272_v28  ;;  %vm1271_vm14 = vcmp.eq.f32.partialorder %v1270_v31, 8.507059e+37 }
 0x24c   : > { %v1245_v16 = vmul.f32 %v3443_v49, %v1244_v15  ;;  %v1248_v17 = vsub.f32 1.0, %v1247_v14 }
 0x24e   : > { %v1249_v20 = vmul.f32 %v3453_v10, %v1248_v17  ;;  %v1291_v22 = vpack.c.bf16 %v1245_v16, %v1245_v16 }
 0x24f   : > { %v3455_v19 = vpop.eup %3454 }
 0x250   : > { %v1262_v23 = vmul.f32 %v3455_v19, %v1227_v8  ;;  %v1250_v24 = vadd.f32 %v3453_v10, %v1249_v20  ;;  %2973 = vmatmul.msk.bf16.vlgmr.msra.gmra.mxu0 %vm1118_vm1, %v1291_v22  ;;  %vm1267_vm11 = vweird.f32 %v3455_v19  ;;  %v3414_v22 = vld [vmem:[%s4362_s8] ss:$0 sm:$0xff] }
 0x251   : > { %vm1268_vm13 = vmor %vm1266_vm12, %vm1267_vm11 }
 0x252   : > { %v1263_v26 = vsub.f32 1.0, %v1262_v23  ;;  %v1254_v27 = vsel %vm1253_vm9, %v3453_v10, %v1250_v24 }
 0x253   : > { %v1259_v29 = vsel %vm1256_vm10, %v1258_v25, %v1254_v27  ;;  %vm1595_vm10 = vcmask 523264  }
 0x254   : > { %v1264_v30 = vmul.f32 %v3455_v19, %v1263_v26  ;;  %v1260_v32 = vmul.f32 %v3445_v55, %v1259_v29  ;;  %v1381_v55 = vld [vmem:[%s4361_s22 + $0x4] sm:$0xf]  ;;  %v3558_v29 = vmov 32.0  }
 0x255   : > { %v1407_v56 = vsel %vm1302_vm2, %v1381_v55, 0 }
 0x256   : > { %v1265_v33 = vadd.f32 %v3455_v19, %v1264_v30  ;;  %v1230_v35 = vpop.xlane.xlu2 %1229  ;;  %v1292_v36 = vpack.c.bf16 %v1260_v32, %v1260_v32  ;;  %1416 = vmatpush.bf16.msra.mxu1 %v1407_v56 }
 0x257   : > { %3456 = vrcp.f32 %v1230_v35  ;;  %v1287_v44 = vand.u32 2147483648, %v1230_v35  ;;  %v1285_v46 = vand.u32 2147483647, %v1230_v35  ;;  %vm1281_vm3 = vweird.f32 %v1230_v35 }
 0x258   : > { %v1269_v37 = vsel %vm1268_vm13, %v3455_v19, %v1265_v33  ;;  %2974 = vmatmul.msk.bf16.vlgmr.msrb.gmra.mxu1 %vm1118_vm1, %v1292_v36  ;;  %3458 = vrcp.f32 %v3558_v29  ;;  %v3320_v29 = vld [vmem:[%s4354_s4 + $0x50] sm:$0xff] }
 0x259   : > { %v1274_v38 = vsel %vm1271_vm14, %v1273_v34, %v1269_v37  ;;  %v1288_v48 = vor.u32 1.1754944e-38, %v1287_v44  ;;  %vm1286_vm5 = vcmp.eq.f32.partialorder %v1285_v46, 8.507059e+37 }
 0x25a   : > { %v1275_v39 = vmul.f32 %v3878_v57, %v1274_v38  ;;  %v1382_v57 = vld [vmem:[%s4361_s22 + $0x8] sm:$0xf] }
 0x25b   : > { %v1426_v58 = vsel %vm1302_vm2, %v1382_v57, 0 }
 0x25c   : > { %v1293_v40 = vpack.c.bf16 %v1275_v39, %v1275_v39  ;;  %1435 = vmatpush.bf16.msrb.mxu2 %v1426_v58  ;;  %v3317_v58 = vld [vmem:[%s4301_s15 + $0x18] sm:$0xff] }
 0x25d   : > { %v3457_v41 = vpop.eup %3456  ;;  %1603 = vmatpush.bf16.msrb.mxu1 %v3317_v58  ;;  %v3339_v58 = vld [vmem:[%s4357_s29 + $0x68] sm:$0xff] }
 0x25e   : > { %2975 = vmatmul.msk.bf16.vlgmr.msra.gmra.mxu2 %vm1118_vm1, %v1293_v40  ;;  %v1277_v42 = vmul.f32 %v3457_v41, %v1230_v35  ;;  %vm1282_vm15 = vweird.f32 %v3457_v41  ;;  %v3459_v30 = vpop.eup %3458  ;;  %v3313_v40 = vld [vmem:[%s4299_s13 + $0x8] sm:$0xff] }
 0x25f   : > { %vm1283_vm4 = vmor %vm1281_vm3, %vm1282_vm15  ;;  %v1479_v31 = vmul.f32 32.0, %v3459_v30  ;;  %vm1483_vm6 = vweird.f32 %v3459_v30  ;;  %1542 = vmatpush.bf16.msra.mxu0 %v3313_v40 }
 0x260   : > { %v1278_v43 = vsub.f32 1.0, %v1277_v42 }
 0x261   : > { %v1480_v32 = vsub.f32 1.0, %v1479_v31  ;;  %1604 = vmatpush.bf16.msrb.mxu1 %v3316_v59  ;;  %v3324_v31 = vld [vmem:[%s4354_s4 + $0x70] sm:$0xff]  ;;  %v3341_v59 = vld [vmem:[%s4357_s29 + $0x78] sm:$0xff] }
 0x262   : > { %v1279_v45 = vmul.f32 %v3457_v41, %v1278_v43 }
 0x263   : > { %v1481_v33 = vmul.f32 %v3459_v30, %v1480_v32 }
 0x264   : > { %v1280_v47 = vadd.f32 %v3457_v41, %v1279_v45 }
 0x265   : > { %v1482_v34 = vadd.f32 %v3459_v30, %v1481_v33  ;;  %1605 = vmatpush.bf16.msrb.mxu1 %v3315_v60  ;;  %v3327_v33 = vld [vmem:[%s4355_s2 + $0x48] sm:$0xff]  ;;  %v3334_v60 = vld [vmem:[%s4357_s29 + $0x40] sm:$0xff] }
 0x266   : > { %v1284_v49 = vsel %vm1283_vm4, %v3457_v41, %v1280_v47  ;;  %v3312_v41 = vld [vmem:[%s4299_s13] sm:$0xff] }
 0x267   : > { %v1289_v50 = vsel %vm1286_vm5, %v1288_v48, %v1284_v49  ;;  %v3921_v35 = vsel %vm1483_vm6, %v3459_v30, %v1482_v34  ;;  %1543 = vmatpush.bf16.msra.mxu0 %v3312_v41  ;;  %v3322_v30 = vld [vmem:[%s4354_s4 + $0x60] sm:$0xff]  ;;  %v3329_v34 = vld [vmem:[%s4355_s2 + $0x58] sm:$0xff] }
 0x268   : > { %v1290_v51 = vmul.f32 %v3882_v62, %v1289_v50  ;;  %v3330_v41 = vld [vmem:[%s4355_s2 + $0x60] sm:$0xff] }
 0x26a   : > { %v1294_v52 = vpack.c.bf16 %v1290_v51, %v1290_v51  ;;  %v3415_v51 = vld [vmem:[%s4363_s9] ss:$0 sm:$0xff] }
 0x26c   : > { %2976 = vmatmul.msk.bf16.vlgmr.msrb.gmra.mxu3 %vm1118_vm1, %v1294_v52 }
 0x2cd   : > { %v1315_v61 = vpop.f32.mrf.mxu0 }
 0x2ce   : > { %v1376_v62 = vpack.c.bf16 %v1315_v61, %v1315_v61  ;;  %v3314_v61 = vld [vmem:[%s4301_s15] sm:$0xff] }
 0x2cf   : > { %1606 = vmatpush.bf16.msrb.mxu1 %v3314_v61  ;;  %v3336_v61 = vld [vmem:[%s4357_s29 + $0x50] sm:$0xff] }
 0x2d0   : > { %2977 = vmatmul.msk.bf16.vlgmr.msrb.gmra.mxu0 %vm1118_vm1, %v1376_v62  ;;  %v3417_v62 = vld [vmem:[%s4300_s14] ss:$0 sm:$0xff] }
 0x2d5   : > { %v1317_v63 = vpop.f32.mrf.mxu0  ;;  %v1334_v0 = vpop.f32.mrf.mxu1 }
 0x2d6   : > { %v1377_v1 = vpack.c.bf16 %v1334_v0, %v1334_v0 }
 0x2d8   : > { %2978 = vmatmul.msk.bf16.vlgmr.msra.gmra.mxu1 %vm1118_vm1, %v1377_v1 }
 0x2dd   : > { %v1336_v2 = vpop.f32.mrf.mxu1 }
 0x2e1   : > { %v1353_v3 = vpop.f32.mrf.mxu2 }
 0x2e2   : > { %v1378_v4 = vpack.c.bf16 %v1353_v3, %v1353_v3 }
 0x2e4   : > { %2979 = vmatmul.msk.bf16.vlgmr.msrb.gmra.mxu2 %vm1118_vm1, %v1378_v4 }
 0x2e9   : > { %v1355_v5 = vpop.f32.mrf.mxu2 }
 0x2ef   : > { %v1372_v6 = vpop.f32.mrf.mxu3 }
 0x2f0   : > { %v1379_v7 = vpack.c.bf16 %v1372_v6, %v1372_v6 }
 0x2f2   : > { %2980 = vmatmul.msk.bf16.vlgmr.msra.gmra.mxu3 %vm1118_vm1, %v1379_v7 }
 0x2f7   : > { %v1374_v8 = vpop.f32.mrf.mxu3 }
 0x34d   : > { %v1399_v9 = vpop.f32.mrf.mxu0 }
 0x34e   : > { %v1460_v17 = vsel %vm754_vm0, %v1399_v9, 0.0 }
 0x355   : > { %v1401_v10 = vpop.f32.mrf.mxu0  ;;  %v1418_v11 = vpop.f32.mrf.mxu1 }
 0x356   : > { %v1461_v16 = vsel %vm754_vm0, %v1418_v11, 0.0 }
 0x357   : > { %v1462_v19 = vadd.f32 %v1461_v16, %v1460_v17 }
 0x35d   : > { %v1420_v13 = vpop.f32.mrf.mxu1 }
 0x35e   : > { %v3418_v13 = vld [vmem:[%s4302_s16] ss:$0 sm:$0xff] }
 0x367   : > { %v1437_v14 = vpop.f32.mrf.mxu2 }
 0x368   : > { %v1463_v18 = vsel %vm754_vm0, %v1437_v14, 0.0 }
 0x369   : > { %v1464_v20 = vadd.f32 %v1463_v18, %v1462_v19 }
 0x36f   : > { %v1439_v15 = vpop.f32.mrf.mxu2 }
 0x375   : > { %v1456_v21 = vpop.f32.mrf.mxu3 }
 0x376   : > { %v1465_v23 = vsel %vm754_vm0, %v1456_v21, 0.0 }
 0x377   : > { %v1466_v24 = vadd.f32 %v1465_v23, %v1464_v20 }
 0x379   : > { %v1471_v25 = vadd.f32 %v3414_v22, %v1466_v24  ;;  %v3319_v24 = vld [vmem:[%s4354_s4 + $0x48] sm:$0xff] }
 0x37a   : > { %1701 = vmatpush.bf16.msra.mxu2 %v3319_v24 }
 0x37b   : > { %v1472_v26 = vadd.f32 %v1471_v25, %v3769_v12  ;;  %v3321_v25 = vld [vmem:[%s4354_s4 + $0x58] sm:$0xff] }
 0x37c   : > { %1726 = vmatpush.bf16.msrb.mxu3 %v3321_v25 }
 0x37d   : > { %v1458_v27 = vpop.f32.mrf.mxu3  ;;  %v1475_v28 = vsel %vm754_vm0, %v1472_v26, 0.0 }
 0x37e   : > { %1476 = vadd.xlane.f32.xlu2 %v1475_v28  ;;  %v3325_v27 = vld [vmem:[%s4354_s4 + $0x78] sm:$0xff]  ;;  %v3318_v28 = vld [vmem:[%s4354_s4 + $0x40] sm:$0xff] }
 0x37f   : > { %1776 = vmatpush.bf16.msra.mxu1 %v3325_v27  ;;  %1702 = vmatpush.bf16.msra.mxu2 %v3318_v28 }
 0x380   : > { %1727 = vmatpush.bf16.msrb.mxu3 %v3320_v29  ;;  %v3423_v29 = vld [vmem:[%s4359_s6 + $0x4] ss:$0 sm:$0xff] }
 0x383   : > { %1777 = vmatpush.bf16.msra.mxu1 %v3324_v31  ;;  %1835 = vmatpush.bf16.msrb.mxu2 %v3327_v33 }
 0x384   : > { %1860 = vmatpush.bf16.msra.mxu3 %v3329_v34 }
 0x3f1   : > { %v1477_v36 = vpop.xlane.xlu2 %1476 }
 0x3f2   : > { %v1485_v37 = vmul.f32 %v3921_v35, %v1477_v36  ;;  %v3331_v36 = vld [vmem:[%s4355_s2 + $0x68] sm:$0xff] }
 0x3f4   : > { %v1486_v38 = vsub.f32 %v1472_v26, %v1485_v37  ;;  %v3323_v26 = vld [vmem:[%s4354_s4 + $0x68] sm:$0xff] }
 0x3f5   : > { %1751 = vmatpush.bf16.msrb.mxu0 %v3323_v26 }
 0x3f6   : > { %v1487_v39 = vmul.f32 %v1486_v38, %v1486_v38 }
 0x3f8   : > { %v1488_v12 = vsel %vm754_vm0, %v1487_v39, 0.0  ;;  %v3326_v39 = vld [vmem:[%s4355_s2 + $0x40] sm:$0xff] }
 0x3f9   : > { %1489 = vadd.xlane.f32.xlu0 %v1488_v12  ;;  %1752 = vmatpush.bf16.msrb.mxu0 %v3322_v30  ;;  %v3328_v12 = vld [vmem:[%s4355_s2 + $0x50] sm:$0xff]  ;;  %v3424_v30 = vld [vmem:[%s4359_s6 + $0x5] ss:$0 sm:$0xff] }
 0x3fa   : > { %1836 = vmatpush.bf16.msrb.mxu2 %v3326_v39  ;;  %1861 = vmatpush.bf16.msra.mxu3 %v3328_v12 }
 0x46c   : > { %v1490_v42 = vpop.xlane.xlu0 %1489 }
 0x46d   : > { %v1491_v43 = vmul.f32 %v1490_v42, %v3921_v35  ;;  %v3332_v42 = vld [vmem:[%s4355_s2 + $0x70] sm:$0xff] }
 0x46f   : > { %v1492_v44 = vadd.f32 1e-05, %v1491_v43 }
 0x471   : > { %3460 = vrsqrt.f32 %v1492_v44  ;;  %vm1499_vm8 = vweird.f32 %v1492_v44 }
 0x477   : > { %v3461_v45 = vpop.eup %3460 }
 0x478   : > { %v1494_v46 = vmul.f32 %v3461_v45, %v1492_v44  ;;  %vm1500_vm7 = vweird.f32 %v3461_v45 }
 0x479   : > { %vm1501_vm9 = vmor %vm1499_vm8, %vm1500_vm7 }
 0x47a   : > { %v1495_v47 = vmul.f32 %v3461_v45, %v1494_v46 }
 0x47c   : > { %v1496_v48 = vmul.f32 0.5, %v1495_v47 }
 0x47e   : > { %v1497_v49 = vsub.f32 1.5, %v1496_v48 }
 0x480   : > { %v1498_v50 = vmul.f32 %v3461_v45, %v1497_v49  ;;  %v3419_v49 = vld [vmem:[%s4297_s11] ss:$0 sm:$0xff] }
 0x482   : > { %v1502_v52 = vsel %vm1501_vm9, %v3461_v45, %v1498_v50 }
 0x483   : > { %v1503_v54 = vmul.f32 %v1502_v52, %v1486_v38  ;;  %v3333_v38 = vld [vmem:[%s4355_s2 + $0x78] sm:$0xff] }
 0x485   : > { %v1507_v55 = vmul.f32 %v3415_v51, %v1503_v54  ;;  %v3420_v51 = vld [vmem:[%s4298_s12] ss:$0 sm:$0xff] }
 0x487   : > { %v1511_v56 = vadd.f32 %v3416_v53, %v1507_v55 }
 0x489   : > { %v1517_v57 = vpack.c.bf16 %v1511_v56, %v1511_v56 }
 0x48b   : > { %2989 = vmatmul.msk.bf16.vlgmr.msra.gmra.mxu0 %vm754_vm0, %v1517_v57  ;;  %v3337_v57 = vld [vmem:[%s4357_s29 + $0x58] sm:$0xff] }
 0x48c   : > { %1885 = vmatpush.bf16.msra.mxu0 %v3331_v36 }
 0x490   : > { %1886 = vmatpush.bf16.msra.mxu0 %v3330_v41 }
 0x508   : > { %v1545_v63 = vpop.f32.mrf.mxu0 }
 0x509   : > { %v1546_v0 = vadd.f32 %v3417_v62, %v1545_v63  ;;  %v3338_v62 = vld [vmem:[%s4357_s29 + $0x60] sm:$0xff]  ;;  %v3340_v63 = vld [vmem:[%s4357_s29 + $0x70] sm:$0xff] }
 0x50b   : > { %v1549_v1 = vmul.f32 %v1546_v0, %v1546_v0 }
 0x50d   : > { %v1550_v2 = vmul.f32 %v1549_v1, %v1546_v0 }
 0x50f   : > { %v1551_v3 = vmul.f32 0.044715, %v1550_v2 }
 0x510   : > { %v1547_v4 = vpop.f32.mrf.mxu0 }
 0x511   : > { %v1552_v5 = vadd.f32 %v1551_v3, %v1546_v0 }
 0x513   : > { %v1553_v6 = vmul.f32 0.7978846, %v1552_v5 }
 0x515   : > { %3462 = vtanh.f32 %v1553_v6 }
 0x51b   : > { %v3463_v7 = vpop.eup %3462 }
 0x51c   : > { %v1555_v8 = vadd.f32 1.0, %v3463_v7 }
 0x51e   : > { %v1556_v9 = vmul.f32 0.5, %v1555_v8  ;;  %v3425_v8 = vld [vmem:[%s4358_s30 + $0x6] ss:$0 sm:$0xff] }
 0x520   : > { %v1557_v10 = vmul.f32 %v1556_v9, %v1546_v0  ;;  %v3426_v9 = vld [vmem:[%s4358_s30 + $0x7] ss:$0 sm:$0xff] }
 0x522   : > { %v1567_v11 = vpack.c.bf16 %v1557_v10, %v1557_v10 }
 0x524   : > { %3006 = vmatmul.msk.bf16.vlgmr.msrb.gmra.mxu1 %vm1595_vm10, %v1567_v11 }
 0x525   : > { %1910 = vmatpush.bf16.msrb.mxu1 %v3333_v38 }
 0x529   : > { %1911 = vmatpush.bf16.msrb.mxu1 %v3332_v42 }
 0x5a1   : > { %v1608_v14 = vpop.f32.mrf.mxu1 }
 0x5a2   : > { %v1609_v15 = vadd.f32 %v3418_v13, %v1608_v14 }
 0x5a4   : > { %v1612_v16 = vadd.f32 %v1609_v15, %v1511_v56  ;;  %v3335_v56 = vld [vmem:[%s4357_s29 + $0x48] sm:$0xff]  ;;  %v3427_v15 = vld [vmem:[%s4358_s30 + $0x4] ss:$0 sm:$0xff] }
 0x5a6   : > { %v1615_v17 = vsel %vm754_vm0, %v1612_v16, 0.0 }
 0x5a7   : > { %1616 = vadd.xlane.f32.xlu1 %v1615_v17  ;;  %v3421_v17 = vld [vmem:[%s4359_s6 + $0x6] ss:$0 sm:$0xff] }
 0x5a9   : > { %v1610_v18 = vpop.f32.mrf.mxu1 }
 0x5aa   : > { %v3422_v18 = vld [vmem:[%s4359_s6 + $0x7] ss:$0 sm:$0xff]  ;;  %s2801_s6 = sshll.u32 %s2797_s23, 4  ;;  %s2802_s6 = int_to_ptr.hbm [resolvable:$true] %s2801_s6 }
 0x61a   : > { %v1617_v19 = vpop.xlane.xlu1 %1616 }
 0x61b   : > { %v1618_v20 = vmul.f32 %v1617_v19, %v3921_v35 }
 0x61d   : > { %v1619_v21 = vsub.f32 %v1612_v16, %v1618_v20  ;;  %v3428_v16 = vld [vmem:[%s4358_s30 + $0x5] ss:$0 sm:$0xff] }
 0x61f   : > { %v1620_v22 = vmul.f32 %v1619_v21, %v1619_v21 }
 0x621   : > { %v1621_v23 = vsel %vm754_vm0, %v1620_v22, 0.0 }
 0x622   : > { %1622 = vadd.xlane.f32.xlu2 %v1621_v23 }
 0x695   : > { %v1623_v32 = vpop.xlane.xlu2 %1622 }
 0x696   : > { %v1624_v37 = vmul.f32 %v1623_v32, %v3921_v35 }
 0x698   : > { %v1625_v40 = vadd.f32 1e-05, %v1624_v37 }
 0x69a   : > { %3464 = vrsqrt.f32 %v1625_v40  ;;  %vm1632_vm12 = vweird.f32 %v1625_v40 }
 0x6a0   : > { %v3465_v43 = vpop.eup %3464 }
 0x6a1   : > { %v1627_v44 = vmul.f32 %v3465_v43, %v1625_v40  ;;  %vm1633_vm11 = vweird.f32 %v3465_v43 }
 0x6a2   : > { %vm1634_vm13 = vmor %vm1632_vm12, %vm1633_vm11 }
 0x6a3   : > { %v1628_v45 = vmul.f32 %v3465_v43, %v1627_v44  ;;  %v3430_v44 = vld [vmem:[%s4360_s3 + $0x7] ss:$0 sm:$0xff] }
 0x6a5   : > { %v1629_v46 = vmul.f32 0.5, %v1628_v45 }
 0x6a7   : > { %v1630_v47 = vsub.f32 1.5, %v1629_v46 }
 0x6a9   : > { %v1631_v48 = vmul.f32 %v3465_v43, %v1630_v47 }
 0x6ab   : > { %v1635_v50 = vsel %vm1634_vm13, %v3465_v43, %v1631_v48  ;;  %v3429_v43 = vld [vmem:[%s4360_s3 + $0x6] ss:$0 sm:$0xff] }
 0x6ac   : > { %v1636_v52 = vmul.f32 %v1635_v50, %v1619_v21 }
 0x6ae   : > { %v1640_v53 = vmul.f32 %v3419_v49, %v1636_v52  ;;  %v3432_v52 = vld [vmem:[%s4360_s3 + $0x5] ss:$0 sm:$0xff] }
 0x6b0   : > { %v4016_v54 = vadd.f32 %v3420_v51, %v1640_v53  ;;  %v3431_v51 = vld [vmem:[%s4360_s3 + $0x4] ss:$0 sm:$0xff]  ;;  %s702_s3 = scalar_lea.vmem [#allocation3], %s701_s24 }
 0x6b1   : > { %s2799_s4 = sshll.u32 %s702_s3, 4  ;;  %s2800_s4 = int_to_ptr.vmem [resolvable:$true] %s2799_s4 }
 0x6b2   : > { %v1645_v55 = vpack.c.bf16 %v4016_v54, %v4016_v54 }
 0x6b4   : > { %3035 = vmatmul.msk.bf16.vlgmr.msra.gmra.mxu2 %vm754_vm0, %v1645_v55  ;;  %3044 = vmatmul.msk.bf16.vlgmr.msrb.gmra.mxu3 %vm754_vm0, %v1645_v55 }
 0x6b5   : > { %3053 = vmatmul.msk.bf16.vlgmr.msrb.gmra.mxu0 %vm754_vm0, %v1645_v55  ;;  %3062 = vmatmul.msk.bf16.vlgmr.msra.gmra.mxu1 %vm754_vm0, %v1645_v55 }
 0x6b6   : > { %1969 = vmatpush.bf16.msra.mxu2 %v3335_v56  ;;  %1994 = vmatpush.bf16.msrb.mxu3 %v3337_v57 }
 0x6b7   : > { %2019 = vmatpush.bf16.msrb.mxu0 %v3339_v58  ;;  %2044 = vmatpush.bf16.msra.mxu1 %v3341_v59 }
 0x6ba   : > { %1970 = vmatpush.bf16.msra.mxu2 %v3334_v60  ;;  %1995 = vmatpush.bf16.msrb.mxu3 %v3336_v61 }
 0x6bb   : > { %2020 = vmatpush.bf16.msrb.mxu0 %v3338_v62  ;;  %2045 = vmatpush.bf16.msra.mxu1 %v3340_v63 }
 0x6c4   : > { %3091 = vmatmul.msk.bf16.vlgmr.msrb.gmra.mxu2 %vm754_vm0, %v1645_v55  ;;  %3100 = vmatmul.msk.bf16.vlgmr.msra.gmra.mxu3 %vm754_vm0, %v1645_v55 }
 0x6c5   : > { %3109 = vmatmul.msk.bf16.vlgmr.msra.gmra.mxu0 %vm754_vm0, %v1645_v55  ;;  %3118 = vmatmul.msk.bf16.vlgmr.msrb.gmra.mxu1 %vm754_vm0, %v1645_v55 }
 0x6d4   : > { %3147 = vmatmul.msk.bf16.vlgmr.msra.gmra.mxu2 %vm754_vm0, %v1645_v55  ;;  %3156 = vmatmul.msk.bf16.vlgmr.msrb.gmra.mxu3 %vm754_vm0, %v1645_v55 }
 0x6d5   : > { %3165 = vmatmul.msk.bf16.vlgmr.msrb.gmra.mxu0 %vm754_vm0, %v1645_v55  ;;  %3174 = vmatmul.msk.bf16.vlgmr.msra.gmra.mxu1 %vm754_vm0, %v1645_v55 }
 0x732   : > { %v1754_v0 = vpop.f32.mrf.mxu0  ;;  %v1779_v1 = vpop.f32.mrf.mxu1 }
 0x733   : > { %v1755_v27 = vadd.f32 %v3421_v17, %v1754_v0  ;;  %v1780_v28 = vadd.f32 %v3422_v18, %v1779_v1 }
 0x735   : > { %v2053_v38 = vpack.c.bf16 %v1755_v27, %v1755_v27  ;;  %v2054_v39 = vpack.c.bf16 %v1780_v28, %v1780_v28 }
 0x737   : > { %v1704_v2 = vpop.f32.mrf.mxu2  ;;  %v1729_v3 = vpop.f32.mrf.mxu3 }
 0x738   : > { %v1705_v12 = vadd.f32 %v3423_v29, %v1704_v2  ;;  %v1730_v40 = vadd.f32 %v3424_v30, %v1729_v3 }
 0x73a   : > { %v1756_v4 = vpop.f32.mrf.mxu0  ;;  %v1781_v5 = vpop.f32.mrf.mxu1  ;;  %v2051_v45 = vpack.c.bf16 %v1705_v12, %v1705_v12  ;;  %v2052_v46 = vpack.c.bf16 %v1730_v40, %v1730_v40 }
 0x73f   : > { %v1706_v6 = vpop.f32.mrf.mxu2  ;;  %v1731_v7 = vpop.f32.mrf.mxu3 }
 0x742   : > { %v1888_v10 = vpop.f32.mrf.mxu0  ;;  %v1913_v11 = vpop.f32.mrf.mxu1 }
 0x743   : > { %v1889_v13 = vadd.f32 %v3425_v8, %v1888_v10  ;;  %v1914_v14 = vadd.f32 %v3426_v9, %v1913_v11 }
 0x745   : > { %v2057_v19 = vpack.c.bf16 %v1889_v13, %v1889_v13  ;;  %v2058_v20 = vpack.c.bf16 %v1914_v14, %v1914_v14 }
 0x747   : > { %v2101_v21 = vsel %vm1118_vm1, %v2057_v19, 0  ;;  %v2120_v22 = vsel %vm1118_vm1, %v2058_v20, 0  ;;  %v1838_v23 = vpop.f32.mrf.mxu2  ;;  %v1863_v24 = vpop.f32.mrf.mxu3 }
 0x748   : > { %v1839_v25 = vadd.f32 %v3427_v15, %v1838_v23  ;;  %v1864_v26 = vadd.f32 %v3428_v16, %v1863_v24  ;;  %2110 = vmatpush.bf16.xpose.msra.mxu0 %v2101_v21  ;;  %2129 = vmatpush.bf16.xpose.msrb.mxu1 %v2120_v22 }
 0x74a   : > { %v2055_v31 = vpack.c.bf16 %v1839_v25, %v1839_v25  ;;  %v2056_v32 = vpack.c.bf16 %v1864_v26, %v1864_v26  ;;  %v1890_v33 = vpop.f32.mrf.mxu0  ;;  %v1915_v34 = vpop.f32.mrf.mxu1 }
 0x74c   : > { %v2063_v36 = vsel %vm1118_vm1, %v2055_v31, 0  ;;  %v2082_v37 = vsel %vm1118_vm1, %v2056_v32, 0 }
 0x74d   : > { %2072 = vmatpush.bf16.xpose.msrb.mxu2 %v2063_v36  ;;  %2091 = vmatpush.bf16.xpose.msra.mxu3 %v2082_v37 }
 0x74f   : > { %3177 = vmatmul.msk.bf16.vlgmr.msra.gmra.mxu0 %vm1118_vm1, %v2053_v38  ;;  %3178 = vmatmul.msk.bf16.vlgmr.msrb.gmra.mxu1 %vm1118_vm1, %v2054_v39  ;;  %v1840_v41 = vpop.f32.mrf.mxu2  ;;  %v1865_v42 = vpop.f32.mrf.mxu3 }
 0x752   : > { %v2022_v47 = vpop.f32.mrf.mxu0  ;;  %v2047_v48 = vpop.f32.mrf.mxu1 }
 0x753   : > { %v2023_v49 = vadd.f32 %v3429_v43, %v2022_v47  ;;  %v2048_v50 = vadd.f32 %v3430_v44, %v2047_v48 }
 0x754   : > { %3175 = vmatmul.msk.bf16.vlgmr.msrb.gmra.mxu2 %vm1118_vm1, %v2051_v45  ;;  %3176 = vmatmul.msk.bf16.vlgmr.msra.gmra.mxu3 %vm1118_vm1, %v2052_v46 }
 0x755   : > { %v2237_v53 = vpack.c.bf16 %v2023_v49, %v2023_v49  ;;  %v2238_v55 = vpack.c.bf16 %v2048_v50, %v2048_v50 }
 0x757   : > { %v2281_v56 = vsel %vm1302_vm2, %v2237_v53, 0  ;;  %v2300_v57 = vsel %vm1302_vm2, %v2238_v55, 0  ;;  %v1972_v58 = vpop.f32.mrf.mxu2  ;;  %v1997_v59 = vpop.f32.mrf.mxu3 }
 0x758   : > { %v1973_v60 = vadd.f32 %v3431_v51, %v1972_v58  ;;  %v1998_v61 = vadd.f32 %v3432_v52, %v1997_v59  ;;  %2290 = vmatpush.bf16.msrb.mxu0 %v2281_v56  ;;  %2309 = vmatpush.bf16.msra.mxu1 %v2300_v57 }
 0x75a   : > { %v2235_v62 = vpack.c.bf16 %v1973_v60, %v1973_v60  ;;  %v2236_v63 = vpack.c.bf16 %v1998_v61, %v1998_v61  ;;  %v2024_v0 = vpop.f32.mrf.mxu0  ;;  %v2049_v1 = vpop.f32.mrf.mxu1 }
 0x75c   : > { %v2243_v2 = vsel %vm1302_vm2, %v2235_v62, 0  ;;  %v2262_v3 = vsel %vm1302_vm2, %v2236_v63, 0 }
 0x75d   : > { %2252 = vmatpush.bf16.msra.mxu2 %v2243_v2  ;;  %2271 = vmatpush.bf16.msrb.mxu3 %v2262_v3 }
 0x75f   : > { %v1974_v4 = vpop.f32.mrf.mxu2  ;;  %v1999_v5 = vpop.f32.mrf.mxu3 }
 0x7cc   : > { %v2112_v6 = vpop.f32.mrf.mxu0  ;;  %v2131_v7 = vpop.f32.mrf.mxu1 }
 0x7cd   : > { %v2141_v8 = vsel %vm1118_vm1, %v2112_v6, -inf  ;;  %v2144_v18 = vsel %vm1118_vm1, %v2131_v7, -inf }
 0x7ce   : > { %2142 = vmax.xlane.f32.xlu2 %v2141_v8 }
 0x7d4   : > { %v2114_v9 = vpop.f32.mrf.mxu0  ;;  %v2133_v10 = vpop.f32.mrf.mxu1 }
 0x7d7   : > { %v2074_v11 = vpop.f32.mrf.mxu2  ;;  %v2093_v13 = vpop.f32.mrf.mxu3 }
 0x7d8   : > { %v2138_v14 = vsel %vm1118_vm1, %v2093_v13, -inf  ;;  %v2135_v15 = vsel %vm1118_vm1, %v2074_v11, -inf }
 0x7d9   : > { %2139 = vmax.xlane.f32.xlu1 %v2138_v14  ;;  %2136 = vmax.xlane.f32.xlu0 %v2135_v15 }
 0x7df   : > { %v2076_v16 = vpop.f32.mrf.mxu2  ;;  %v2095_v17 = vpop.f32.mrf.mxu3 }
 0x7e1   : > { %2145 = vmax.xlane.f32.xlu0 %v2144_v18 }
 0x841   : > { %v2143_v19 = vpop.xlane.xlu2 %2142 }
 0x842   : > { %v2149_v20 = vsub.f32 %v2112_v6, %v2143_v19 }
 0x844   : > { %v2155_v21 = vmul.f32 1.442695, %v2149_v20 }
 0x846   : > { %3466 = vpow2.f32 %v2155_v21 }
 0x84c   : > { %v3467_v22 = vpop.eup %3466  ;;  %v2140_v23 = vpop.xlane.xlu1 %2139 }
 0x84d   : > { %v2137_v24 = vpop.xlane.xlu0 %2136  ;;  %v2148_v25 = vsub.f32 %v2093_v13, %v2140_v23  ;;  %v2165_v27 = vsel %vm1118_vm1, %v3467_v22, 0.0 }
 0x84e   : > { %v2147_v26 = vsub.f32 %v2074_v11, %v2137_v24  ;;  %2166 = vadd.xlane.f32.xlu0 %v2165_v27 }
 0x84f   : > { %v2153_v28 = vmul.f32 1.442695, %v2148_v25 }
 0x850   : > { %v2151_v29 = vmul.f32 1.442695, %v2147_v26 }
 0x851   : > { %3468 = vpow2.f32 %v2153_v28 }
 0x852   : > { %3470 = vpow2.f32 %v2151_v29  ;;  %v3185_v29 = vld [vmem:[%s4361_s22 + $0x18] sm:$0xf] }
 0x855   : > { %v2146_v30 = vpop.xlane.xlu0 %2145 }
 0x856   : > { %v2150_v31 = vsub.f32 %v2131_v7, %v2146_v30  ;;  %v2366_v30 = vsel %vm1302_vm2, %v3185_v29, 0  ;;  %v3346_v29 = vld [vmem:[%s4301_s15 + $0x30] sm:$0xff] }
 0x857   : > { %v4109_v32 = vpop.eup %3468  ;;  %2375 = vmatpush.bf16.msra.mxu0 %v2366_v30  ;;  %v3345_v30 = vld [vmem:[%s4301_s15 + $0x28] sm:$0xff] }
 0x858   : > { %v2157_v33 = vmul.f32 1.442695, %v2150_v31  ;;  %v4111_v34 = vpop.eup %3470  ;;  %v2162_v36 = vsel %vm1118_vm1, %v4109_v32, 0.0  ;;  %v3183_v31 = vld [vmem:[%s4361_s22 + $0x10] sm:$0xf] }
 0x859   : > { %2163 = vadd.xlane.f32.xlu2 %v2162_v36  ;;  %v2159_v37 = vsel %vm1118_vm1, %v4111_v34, 0.0  ;;  %v3186_v36 = vld [vmem:[%s4361_s22 + $0x1c] sm:$0xf] }
 0x85a   : > { %3472 = vpow2.f32 %v2157_v33  ;;  %2160 = vadd.xlane.f32.xlu1 %v2159_v37  ;;  %v2328_v33 = vsel %vm1302_vm2, %v3183_v31, 0  ;;  %v2385_v37 = vsel %vm1302_vm2, %v3186_v36, 0  ;;  %v3344_v31 = vld [vmem:[%s4301_s15 + $0x20] sm:$0xff] }
 0x85b   : > { %2337 = vmatpush.bf16.msrb.mxu2 %v2328_v33  ;;  %2394 = vmatpush.bf16.msrb.mxu1 %v2385_v37 }
 0x860   : > { %v4117_v38 = vpop.eup %3472 }
 0x861   : > { %v2168_v39 = vsel %vm1118_vm1, %v4117_v38, 0.0 }
 0x862   : > { %2169 = vadd.xlane.f32.xlu1 %v2168_v39 }
 0x8c1   : > { %v2167_v12 = vpop.xlane.xlu0 %2166 }
 0x8c2   : > { %3474 = vrcp.f32 %v2167_v12  ;;  %v2212_v43 = vand.u32 2147483648, %v2167_v12  ;;  %v2210_v46 = vand.u32 2147483647, %v2167_v12  ;;  %vm2206_vm15 = vweird.f32 %v2167_v12 }
 0x8c4   : > { %v2213_v49 = vor.u32 1.1754944e-38, %v2212_v43  ;;  %vm2211_vm4 = vcmp.eq.f32.partialorder %v2210_v46, 8.507059e+37 }
 0x8c8   : > { %v3475_v40 = vpop.eup %3474 }
 0x8c9   : > { %v2202_v41 = vmul.f32 %v3475_v40, %v2167_v12  ;;  %vm2207_vm14 = vweird.f32 %v3475_v40 }
 0x8ca   : > { %vm2208_vm3 = vmor %vm2206_vm15, %vm2207_vm14 }
 0x8cb   : > { %v2203_v42 = vsub.f32 1.0, %v2202_v41 }
 0x8cc   : > { %v2164_v44 = vpop.xlane.xlu2 %2163 }
 0x8cd   : > { %v2204_v45 = vmul.f32 %v3475_v40, %v2203_v42  ;;  %3476 = vrcp.f32 %v2164_v44  ;;  %v2161_v47 = vpop.xlane.xlu1 %2160  ;;  %v2197_v61 = vand.u32 2147483648, %v2164_v44  ;;  %v2195_v0 = vand.u32 2147483647, %v2164_v44 }
 0x8ce   : > { %3478 = vrcp.f32 %v2161_v47  ;;  %v2182_v1 = vand.u32 2147483648, %v2161_v47  ;;  %v2180_v3 = vand.u32 2147483647, %v2161_v47  ;;  %vm2191_vm7 = vweird.f32 %v2164_v44 }
 0x8cf   : > { %v2205_v48 = vadd.f32 %v3475_v40, %v2204_v45  ;;  %v2198_v5 = vor.u32 1.1754944e-38, %v2197_v61  ;;  %vm2176_vm9 = vweird.f32 %v2161_v47  ;;  %vm2196_vm11 = vcmp.eq.f32.partialorder %v2195_v0, 8.507059e+37  ;;  %v3433_v61 = vld [vmem:[%s4362_s8 + $0x1] ss:$0 sm:$0xff]  ;;  %s2789_s8 = scalar_lea.sflag [#allocation4], %s701_s24 }
 0x8d0   : > { %v2183_v9 = vor.u32 1.1754944e-38, %v2182_v1  ;;  %vm2181_vm13 = vcmp.eq.f32.partialorder %v2180_v3, 8.507059e+37 }
 0x8d1   : > { %v2209_v50 = vsel %vm2208_vm3, %v3475_v40, %v2205_v48 }
 0x8d2   : > { %v2214_v51 = vsel %vm2211_vm4, %v2213_v49, %v2209_v50 }
 0x8d3   : > { %v3477_v52 = vpop.eup %3476  ;;  %v2215_v53 = vmul.f32 %v3467_v22, %v2214_v51 }
 0x8d4   : > { %v3479_v55 = vpop.eup %3478  ;;  %v2187_v56 = vmul.f32 %v3477_v52, %v2164_v44  ;;  %vm2192_vm5 = vweird.f32 %v3477_v52 }
 0x8d5   : > { %v2172_v57 = vmul.f32 %v3479_v55, %v2161_v47  ;;  %v2170_v58 = vpop.xlane.xlu1 %2169  ;;  %v2233_v59 = vpack.c.bf16 %v2215_v53, %v2215_v53  ;;  %vm2177_vm6 = vweird.f32 %v3479_v55  ;;  %vm2193_vm8 = vmor %vm2191_vm7, %vm2192_vm5 }
 0x8d6   : > { %v2188_v60 = vsub.f32 1.0, %v2187_v56  ;;  %3480 = vrcp.f32 %v2170_v58  ;;  %vm2178_vm12 = vmor %vm2176_vm9, %vm2177_vm6  ;;  %v2227_v18 = vand.u32 2147483648, %v2170_v58  ;;  %v2225_v21 = vand.u32 2147483647, %v2170_v58 }
 0x8d7   : > { %v2173_v62 = vsub.f32 1.0, %v2172_v57  ;;  %3181 = vmatmul.msk.bf16.vlgmr.msrb.gmra.mxu0 %vm1118_vm1, %v2233_v59  ;;  %vm2221_vm15 = vweird.f32 %v2170_v58 }
 0x8d8   : > { %v2189_v63 = vmul.f32 %v3477_v52, %v2188_v60  ;;  %v2228_v24 = vor.u32 1.1754944e-38, %v2227_v18  ;;  %vm2226_vm4 = vcmp.eq.f32.partialorder %v2225_v21, 8.507059e+37  ;;  %v3434_v21 = vld [vmem:[%s4363_s9 + $0x1] ss:$0 sm:$0xff]  ;;  %s3508_s9 = sshra.s32 %s2802_s6, 4  ;;  %s3509_s9 = int_to_ptr.hbm [resolvable:$true] %s3508_s9 }
 0x8d9   : > { %v2174_v2 = vmul.f32 %v3479_v55, %v2173_v62  ;;  %p3515_p0 = scmp.lt.s32.totalorder %s3509_s9, %s4367_s28 }
 0x8da   : > { %v2190_v4 = vadd.f32 %v3477_v52, %v2189_v63 }
 0x8db   : > { %v2175_v6 = vadd.f32 %v3479_v55, %v2174_v2 }
 0x8dc   : > { %v3481_v7 = vpop.eup %3480  ;;  %v2194_v8 = vsel %vm2193_vm8, %v3477_v52, %v2190_v4  ;;  %vm2706_vm8 = vcmask 7168  }
 0x8dd   : > { %v2199_v10 = vsel %vm2196_vm11, %v2198_v5, %v2194_v8  ;;  %v2179_v11 = vsel %vm2178_vm12, %v3479_v55, %v2175_v6  ;;  %v2217_v13 = vmul.f32 %v3481_v7, %v2170_v58  ;;  %vm2222_vm14 = vweird.f32 %v3481_v7 }
 0x8de   : > { %v2200_v14 = vmul.f32 %v4109_v32, %v2199_v10  ;;  %v2184_v15 = vsel %vm2181_vm13, %v2183_v9, %v2179_v11  ;;  %vm2223_vm3 = vmor %vm2221_vm15, %vm2222_vm14  ;;  %v3184_v32 = vld [vmem:[%s4361_s22 + $0x14] sm:$0xf]  ;;  %v3343_v10 = vld [vmem:[%s4299_s13 + $0x18] sm:$0xff]  ;;  %vm2786_vm14 = vcmask 8192  }
 0x8df   : > { %v2185_v16 = vmul.f32 %v4111_v34, %v2184_v15  ;;  %v2218_v17 = vsub.f32 1.0, %v2217_v13  ;;  %v2347_v34 = vsel %vm1302_vm2, %v3184_v32, 0  ;;  %v3436_v32 = vld [vmem:[%s4300_s14 + $0x1] ss:$0 sm:$0xff] }
 0x8e0   : > { %v2232_v19 = vpack.c.bf16 %v2200_v14, %v2200_v14  ;;  %2356 = vmatpush.bf16.msra.mxu3 %v2347_v34 }
 0x8e1   : > { %v2219_v20 = vmul.f32 %v3481_v7, %v2218_v17  ;;  %v2231_v22 = vpack.c.bf16 %v2185_v16, %v2185_v16 }
 0x8e2   : > { %3180 = vmatmul.msk.bf16.vlgmr.msrb.gmra.mxu3 %vm1118_vm1, %v2232_v19 }
 0x8e3   : > { %v2220_v23 = vadd.f32 %v3481_v7, %v2219_v20  ;;  %3179 = vmatmul.msk.bf16.vlgmr.msra.gmra.mxu2 %vm1118_vm1, %v2231_v22 }
 0x8e4   : > { %2480 = vmatpush.bf16.msra.mxu2 %v3343_v10 }
 0x8e5   : > { %v2224_v25 = vsel %vm2223_vm3, %v3481_v7, %v2220_v23  ;;  %v3435_v23 = vld [vmem:[%s4364_s10 + $0x1] ss:$0 sm:$0xff]  ;;  %s3510_s10 = scalar_lea.hbm %s3509_s9, 1 }
 0x8e6   : > { %v2229_v26 = vsel %vm2226_vm4, %v2228_v24, %v2224_v25  ;;  %p3511_p11 = scmp.ne.s32.totalorder %s3509_s9, %s3510_s10  ;;  %p3516_p1 = scmp.lt.s32.totalorder %s3514_s26, %s3510_s10 }
 0x8e7   : > { %v2230_v27 = vmul.f32 %v4117_v38, %v2229_v26 }
 0x8e8   : > { %p3512_p12 = pnand %p3511_p11, %p3721_p5  ;;  %p3517_p2 = por %p3516_p1, %p3515_p0 }
 0x8e9   : > { %v2234_v28 = vpack.c.bf16 %v2230_v27, %v2230_v27 }
 0x8ea   : > { %p3513_p13 = pneg %p3512_p12 }
 0x8eb   : > { %3182 = vmatmul.msk.bf16.vlgmr.msra.gmra.mxu1 %vm1118_vm1, %v2234_v28  ;;  %v3347_v28 = vld [vmem:[%s4301_s15 + $0x38] sm:$0xff] }
 0x8ec   : > { %2542 = vmatpush.bf16.msrb.mxu3 %v3347_v28  ;;  %p3518_p3 = pnand %p3517_p2, %p3513_p13 }
 0x8f0   : > { %2543 = vmatpush.bf16.msrb.mxu3 %v3346_v29 }
 0x8f4   : > { %2544 = vmatpush.bf16.msrb.mxu3 %v3345_v30 }
 0x8f8   : > { %2545 = vmatpush.bf16.msrb.mxu3 %v3344_v31 }
 0x954   : > { %v2292_v38 = vpop.f32.mrf.mxu0 }
 0x955   : > { %v2317_v39 = vpack.c.bf16 %v2292_v38, %v2292_v38 }
 0x957   : > { %3189 = vmatmul.msk.bf16.vlgmr.msra.gmra.mxu0 %vm1118_vm1, %v2317_v39 }
 0x95c   : > { %v2294_v12 = vpop.f32.mrf.mxu0 }
 0x965   : > { %v2273_v40 = vpop.f32.mrf.mxu3 }
 0x966   : > { %v2254_v41 = vpop.f32.mrf.mxu2  ;;  %v2316_v42 = vpack.c.bf16 %v2273_v40, %v2273_v40 }
 0x967   : > { %v2315_v43 = vpack.c.bf16 %v2254_v41, %v2254_v41 }
 0x968   : > { %v2311_v44 = vpop.f32.mrf.mxu1  ;;  %3188 = vmatmul.msk.bf16.vlgmr.msra.gmra.mxu3 %vm1118_vm1, %v2316_v42 }
 0x969   : > { %v2318_v45 = vpack.c.bf16 %v2311_v44, %v2311_v44  ;;  %3187 = vmatmul.msk.bf16.vlgmr.msrb.gmra.mxu2 %vm1118_vm1, %v2315_v43 }
 0x96b   : > { %3190 = vmatmul.msk.bf16.vlgmr.msrb.gmra.mxu1 %vm1118_vm1, %v2318_v45 }
 0x96d   : > { %v2275_v46 = vpop.f32.mrf.mxu3 }
 0x96e   : > { %v2256_v47 = vpop.f32.mrf.mxu2  ;;  %v3437_v46 = vld [vmem:[%s4302_s16 + $0x1] ss:$0 sm:$0xff] }
 0x970   : > { %v2313_v48 = vpop.f32.mrf.mxu1 }
 0x9d4   : > { %v2377_v49 = vpop.f32.mrf.mxu0 }
 0x9d5   : > { %v2403_v58 = vsel %vm754_vm0, %v2377_v49, 0.0 }
 0x9dc   : > { %v2379_v50 = vpop.f32.mrf.mxu0 }
 0x9e8   : > { %v2396_v51 = vpop.f32.mrf.mxu1 }
 0x9e9   : > { %v2405_v62 = vsel %vm754_vm0, %v2396_v51, 0.0 }
 0x9eb   : > { %v2358_v52 = vpop.f32.mrf.mxu3 }
 0x9ec   : > { %v2339_v53 = vpop.f32.mrf.mxu2  ;;  %v2401_v55 = vsel %vm754_vm0, %v2358_v52, 0.0 }
 0x9ed   : > { %v2400_v56 = vsel %vm754_vm0, %v2339_v53, 0.0 }
 0x9ee   : > { %v2402_v57 = vadd.f32 %v2401_v55, %v2400_v56 }
 0x9f0   : > { %v2404_v59 = vadd.f32 %v2403_v58, %v2402_v57  ;;  %v2398_v60 = vpop.f32.mrf.mxu1  ;;  %v3349_v58 = vld [vmem:[%s4303_s17 + $0x8] sm:$0xff] }
 0x9f1   : > { %2616 = vmatpush.bf16.msrb.mxu0 %v3349_v58  ;;  %v3357_v60 = vld [vmem:[%s4305_s19 + $0x38] sm:$0xff] }
 0x9f2   : > { %v2406_v63 = vadd.f32 %v2405_v62, %v2404_v59  ;;  %v3348_v59 = vld [vmem:[%s4303_s17] sm:$0xff]  ;;  %2693 = vmatpush.bf16.msra.mxu1 %v3357_v60 }
 0x9f3   : > { %v2360_v0 = vpop.f32.mrf.mxu3  ;;  %v3358_v60 = vld [vmem:[%s4307_s21] sm:$0xff] }
 0x9f4   : > { %v2341_v1 = vpop.f32.mrf.mxu2  ;;  %v2412_v2 = vadd.f32 %v3433_v61, %v2406_v63  ;;  %v3356_v63 = vld [vmem:[%s4305_s19 + $0x30] sm:$0xff] }
 0x9f5   : > { %2617 = vmatpush.bf16.msrb.mxu0 %v3348_v59  ;;  %v3355_v1 = vld [vmem:[%s4305_s19 + $0x28] sm:$0xff] }
 0x9f6   : > { %v2413_v3 = vadd.f32 %v2412_v2, %v4016_v54  ;;  %v3342_v54 = vld [vmem:[%s4299_s13 + $0x10] sm:$0xff]  ;;  %2694 = vmatpush.bf16.msra.mxu1 %v3356_v63  ;;  %v3354_v2 = vld [vmem:[%s4305_s19 + $0x20] sm:$0xff]  ;;  %v3359_v59 = vld [vmem:[%s4307_s21 + $0x8] sm:$0xff] }
 0x9f7   : > { %2481 = vmatpush.bf16.msra.mxu2 %v3342_v54  ;;  %v3439_v54 = vld [vmem:[%s4298_s12 + $0x1] ss:$0 sm:$0xff] }
 0x9f8   : > { %v2418_v4 = vsel %vm754_vm0, %v2413_v3, 0.0 }
 0x9f9   : > { %2419 = vadd.xlane.f32.xlu2 %v2418_v4 }
 0x9fa   : > { %2695 = vmatpush.bf16.msra.mxu1 %v3355_v1 }
 0x9fb   : > { %2779 = vmatpush.bf16.msrb.mxu2 %v3359_v59 }
 0x9fe   : > { %2696 = vmatpush.bf16.msra.mxu1 %v3354_v2 }
 0x9ff   : > { %2780 = vmatpush.bf16.msrb.mxu2 %v3358_v60 }
 0xa6c   : > { %v2420_v5 = vpop.xlane.xlu2 %2419 }
 0xa6d   : > { %v2421_v6 = vmul.f32 %v2420_v5, %v3921_v35 }
 0xa6f   : > { %v2422_v7 = vsub.f32 %v2413_v3, %v2421_v6 }
 0xa71   : > { %v2423_v8 = vmul.f32 %v2422_v7, %v2422_v7 }
 0xa73   : > { %v2424_v9 = vsel %vm754_vm0, %v2423_v8, 0.0 }
 0xa74   : > { %2425 = vadd.xlane.f32.xlu0 %v2424_v9  ;;  %v3438_v9 = vld [vmem:[%s4297_s11 + $0x1] ss:$0 sm:$0xff] }
 0xae7   : > { %v2426_v11 = vpop.xlane.xlu0 %2425 }
 0xae8   : > { %v2427_v13 = vmul.f32 %v2426_v11, %v3921_v35 }
 0xaea   : > { %v2428_v14 = vadd.f32 1e-05, %v2427_v13 }
 0xaec   : > { %3482 = vrsqrt.f32 %v2428_v14  ;;  %vm2435_vm2 = vweird.f32 %v2428_v14 }
 0xaf2   : > { %v3483_v15 = vpop.eup %3482 }
 0xaf3   : > { %v2430_v16 = vmul.f32 %v3483_v15, %v2428_v14  ;;  %vm2436_vm1 = vweird.f32 %v3483_v15 }
 0xaf4   : > { %vm2437_vm5 = vmor %vm2435_vm2, %vm2436_vm1 }
 0xaf5   : > { %v2431_v17 = vmul.f32 %v3483_v15, %v2430_v16  ;;  %v3352_v16 = vld [vmem:[%s4305_s19 + $0x10] sm:$0xff] }
 0xaf7   : > { %v2432_v18 = vmul.f32 0.5, %v2431_v17  ;;  %v3351_v17 = vld [vmem:[%s4305_s19 + $0x8] sm:$0xff] }
 0xaf9   : > { %v2433_v19 = vsub.f32 1.5, %v2432_v18  ;;  %v3350_v18 = vld [vmem:[%s4305_s19] sm:$0xff] }
 0xafb   : > { %v2434_v20 = vmul.f32 %v3483_v15, %v2433_v19  ;;  %v3440_v19 = vld [vmem:[%s4304_s18] ss:$0 sm:$0xff] }
 0xafd   : > { %v2438_v22 = vsel %vm2437_vm5, %v3483_v15, %v2434_v20 }
 0xafe   : > { %v2439_v24 = vmul.f32 %v2438_v22, %v2422_v7 }
 0xb00   : > { %v2443_v25 = vmul.f32 %v3434_v21, %v2439_v24 }
 0xb02   : > { %v2447_v26 = vadd.f32 %v3435_v23, %v2443_v25  ;;  %v3441_v25 = vld [vmem:[#allocation2] ss:$0 sm:$0xff] }
 0xb04   : > { %v2455_v27 = vpack.c.bf16 %v2447_v26, %v2447_v26 }
 0xb06   : > { %3207 = vmatmul.msk.bf16.vlgmr.msra.gmra.mxu2 %vm754_vm0, %v2455_v27 }
 0xb89   : > { %v2483_v33 = vpop.f32.mrf.mxu2 }
 0xb8a   : > { %v2484_v34 = vadd.f32 %v3436_v32, %v2483_v33  ;;  %v3559_v33 = vmov 0  }
 0xb8b   : > { %3401 = vset.pattern.permute.xlu0 %v3559_v33 }
 0xb8c   : > { %v2487_v36 = vmul.f32 %v2484_v34, %v2484_v34 }
 0xb8e   : > { %v2488_v37 = vmul.f32 %v2487_v36, %v2484_v34 }
 0xb90   : > { %v2489_v38 = vmul.f32 0.044715, %v2488_v37 }
 0xb91   : > { %v2485_v39 = vpop.f32.mrf.mxu2 }
 0xb92   : > { %v2490_v12 = vadd.f32 %v2489_v38, %v2484_v34 }
 0xb94   : > { %v2491_v40 = vmul.f32 0.7978846, %v2490_v12 }
 0xb96   : > { %3484 = vtanh.f32 %v2491_v40 }
 0xb9c   : > { %v3485_v41 = vpop.eup %3484 }
 0xb9d   : > { %v2493_v42 = vadd.f32 1.0, %v3485_v41 }
 0xb9f   : > { %v2494_v43 = vmul.f32 0.5, %v2493_v42 }
 0xba1   : > { %v2495_v44 = vmul.f32 %v2494_v43, %v2484_v34 }
 0xba3   : > { %v2507_v45 = vpack.c.bf16 %v2495_v44, %v2495_v44 }
 0xba5   : > { %3233 = vmatmul.msk.bf16.vlgmr.msrb.gmra.mxu3 %vm1595_vm10, %v2507_v45 }
 0xc28   : > { %v2547_v47 = vpop.f32.mrf.mxu3 }
 0xc29   : > { %v2548_v48 = vadd.f32 %v3437_v46, %v2547_v47 }
 0xc2b   : > { %v2551_v49 = vadd.f32 %v2548_v48, %v2447_v26 }
 0xc2d   : > { %v2556_v50 = vsel %vm754_vm0, %v2551_v49, 0.0 }
 0xc2e   : > { %2557 = vadd.xlane.f32.xlu1 %v2556_v50 }
 0xc30   : > { %v2549_v51 = vpop.f32.mrf.mxu3 }
 0xca1   : > { %v2558_v52 = vpop.xlane.xlu1 %2557 }
 0xca2   : > { %v2559_v53 = vmul.f32 %v2558_v52, %v3921_v35 }
 0xca4   : > { %v2560_v55 = vsub.f32 %v2551_v49, %v2559_v53 }
 0xca6   : > { %v2561_v56 = vmul.f32 %v2560_v55, %v2560_v55 }
 0xca8   : > { %v2562_v57 = vsel %vm754_vm0, %v2561_v56, 0.0 }
 0xca9   : > { %2563 = vadd.xlane.f32.xlu2 %v2562_v57 }
 0xd1c   : > { %v2564_v61 = vpop.xlane.xlu2 %2563 }
 0xd1d   : > { %v2565_v62 = vmul.f32 %v2564_v61, %v3921_v35  ;;  %v3353_v35 = vld [vmem:[%s4305_s19 + $0x18] sm:$0xff] }
 0xd1e   : > { %2697 = vmatpush.bf16.msra.mxu1 %v3353_v35 }
 0xd1f   : > { %v2566_v0 = vadd.f32 1e-05, %v2565_v62 }
 0xd21   : > { %3486 = vrsqrt.f32 %v2566_v0  ;;  %vm2573_vm6 = vweird.f32 %v2566_v0 }
 0xd22   : > { %2698 = vmatpush.bf16.msra.mxu1 %v3352_v16 }
 0xd26   : > { %2699 = vmatpush.bf16.msra.mxu1 %v3351_v17 }
 0xd27   : > { %v3487_v3 = vpop.eup %3486 }
 0xd28   : > { %v2568_v4 = vmul.f32 %v3487_v3, %v2566_v0  ;;  %vm2574_vm10 = vweird.f32 %v3487_v3 }
 0xd29   : > { %vm2575_vm7 = vmor %vm2573_vm6, %vm2574_vm10 }
 0xd2a   : > { %v2569_v5 = vmul.f32 %v3487_v3, %v2568_v4  ;;  %2700 = vmatpush.bf16.msra.mxu1 %v3350_v18 }
 0xd2c   : > { %v2570_v6 = vmul.f32 0.5, %v2569_v5 }
 0xd2e   : > { %v2571_v7 = vsub.f32 1.5, %v2570_v6  ;;  %v2756_v6 = vld [vmem:[%s4368_s7] sm:$0x1] }
 0xd30   : > { %v2572_v8 = vmul.f32 %v3487_v3, %v2571_v7 }
 0xd32   : > { %v2576_v10 = vsel %vm2575_vm7, %v3487_v3, %v2572_v8 }
 0xd33   : > { %v2577_v11 = vmul.f32 %v2576_v10, %v2560_v55 }
 0xd35   : > { %v2581_v13 = vmul.f32 %v3438_v9, %v2577_v11 }
 0xd37   : > { %v4223_v14 = vadd.f32 %v3439_v54, %v2581_v13 }
 0xd39   : > { %v2591_v15 = vpack.c.bf16 %v4223_v14, %v4223_v14 }
 0xd3b   : > { %3244 = vmatmul.msk.bf16.vlgmr.msrb.gmra.mxu0 %vm754_vm0, %v2591_v15 }
 0xdb8   : > { %v2619_v20 = vpop.f32.mrf.mxu0 }
 0xdb9   : > { %v2620_v21 = vadd.f32 %v3440_v19, %v2619_v20 }
 0xdbb   : > { %3488 = vtanh.f32 %v2620_v21 }
 0xdc0   : > { %v2621_v22 = vpop.f32.mrf.mxu0 }
 0xdc1   : > { %v3489_v23 = vpop.eup %3488 }
 0xdc2   : > { %v2641_v24 = vpack.c.bf16 %v3489_v23, %v3489_v23 }
 0xdc4   : > { %2701 = vmatmul.bf16.vlgmr.msra.gmra.mxu1 %v2641_v24 }
 0xe41   : > { %v2702_v26 = vpop.f32.mrf.mxu1 }
 0xe42   : > { %v2703_v27 = vadd.f32 %v3441_v25, %v2702_v26 }
 0xe44   : > { %v2707_v28 = vsel %vm2706_vm8, %v2703_v27, -inf }
 0xe45   : > { %v2708_v29 = vrot.slane %v2707_v28, 4 }
 0xe47   : > { %v2709_v30 = vmax.f32 %v2707_v28, %v2708_v29 }
 0xe49   : > { %v2710_v31 = vrot.slane %v2709_v30, 2  ;;  %v2704_v32 = vpop.f32.mrf.mxu1 }
 0xe4b   : > { %v2711_v34 = vmax.f32 %v2709_v30, %v2710_v31 }
 0xe4d   : > { %v2712_v36 = vrot.slane %v2711_v34, 1 }
 0xe4f   : > { %v2713_v37 = vmax.f32 %v2711_v34, %v2712_v36 }
 0xe51   : > { %v2714_v38 = vsub.f32 %v2703_v27, %v2713_v37 }
 0xe53   : > { %v2715_v39 = vmul.f32 1.442695, %v2714_v38 }
 0xe55   : > { %3490 = vpow2.f32 %v2715_v39 }
 0xe5b   : > { %v3491_v12 = vpop.eup %3490 }
 0xe5c   : > { %v2717_v40 = vsel %vm2706_vm8, %v3491_v12, 0.0 }
 0xe5d   : > { %v2718_v41 = vrot.slane %v2717_v40, 4 }
 0xe5f   : > { %v2719_v42 = vadd.f32 %v2718_v41, %v2717_v40 }
 0xe61   : > { %v2720_v43 = vrot.slane %v2719_v42, 2 }
 0xe63   : > { %v2721_v44 = vadd.f32 %v2720_v43, %v2719_v42 }
 0xe65   : > { %v2722_v45 = vrot.slane %v2721_v44, 1 }
 0xe67   : > { %v2723_v46 = vadd.f32 %v2722_v45, %v2721_v44 }
 0xe69   : > { %3492 = vrcp.f32 %v2723_v46  ;;  %v2735_v50 = vand.u32 2147483648, %v2723_v46  ;;  %v2733_v52 = vand.u32 2147483647, %v2723_v46  ;;  %vm2729_vm11 = vweird.f32 %v2723_v46 }
 0xe6b   : > { %v2736_v55 = vor.u32 1.1754944e-38, %v2735_v50  ;;  %vm2734_vm13 = vcmp.eq.f32.partialorder %v2733_v52, 8.507059e+37 }
 0xe6f   : > { %v3493_v47 = vpop.eup %3492 }
 0xe70   : > { %v2725_v48 = vmul.f32 %v3493_v47, %v2723_v46  ;;  %vm2730_vm9 = vweird.f32 %v3493_v47 }
 0xe71   : > { %vm2731_vm12 = vmor %vm2729_vm11, %vm2730_vm9 }
 0xe72   : > { %v2726_v49 = vsub.f32 1.0, %v2725_v48 }
 0xe74   : > { %v2727_v51 = vmul.f32 %v3493_v47, %v2726_v49 }
 0xe76   : > { %v2728_v53 = vadd.f32 %v3493_v47, %v2727_v51 }
 0xe78   : > { %v2732_v56 = vsel %vm2731_vm12, %v3493_v47, %v2728_v53 }
 0xe79   : > { %v2737_v57 = vsel %vm2734_vm13, %v2736_v55, %v2732_v56 }
 0xe7a   : > { %v2738_v58 = vmul.f32 %v3491_v12, %v2737_v57 }
 0xe7c   : > { %2741 = vperm.xlu0 %3401, %v2738_v58  }
 0xeee   : > { %v2742_v61 = vpop.permute.xlu0 %2741 }
 0xeef   : > { %v2744_v62 = vmul.f32 %v2742_v61, %v4223_v14 }
 0xef1   : > { %v2745_v63 = vsel %vm754_vm0, %v2744_v62, 0.0 }
 0xef2   : > { %v2746_v0 = vrot.slane %v2745_v63, 4 }
 0xef4   : > { %v2747_v1 = vadd.f32 %v2746_v0, %v2745_v63 }
 0xef6   : > { %v2748_v2 = vrot.slane %v2747_v1, 2 }
 0xef8   : > { %v2749_v3 = vadd.f32 %v2748_v2, %v2747_v1 }
 0xefa   : > { %v2750_v4 = vrot.slane %v2749_v3, 1 }
 0xefc   : > { %v2751_v35 = vadd.f32 %v2750_v4, %v2749_v3 }
 0xefe   : > { %v2757_v5 = vpack.c.bf16 %v2751_v35, %v2751_v35 }
 0xf00   : > { %3285 = vmatmul.msk.bf16.vlgmr.msrb.gmra.mxu2 %vm754_vm0, %v2757_v5 }
 0xf83   : > { %v2782_v7 = vpop.f32.mrf.mxu2 }
 0xf84   : > { %v2783_v8 = vadd.f32 %v2782_v7, %v2756_v6 }
 0xf86   : > { %2787 = vst.msk [vmem:[%s702_s3] sm:$0x1] %vm2786_vm14, %v2783_v8 }
 0xf87   : > { %3521 = shalt.err (!%p3518_p3)
}
 0xf88   : > { %3360 = dma.vmem_to_hbm [thread:$0]  (%p3721_p5), %s2800_s4, 16, %s2802_s6, %s2789_s8  }
 0xf8b   : > { %v2784_v9 = vpop.f32.mrf.mxu2 }
 0xf8c PF: > { %s4370_s3 = sld [smem:[#allocation8_spill]] }
 0xf8d   : > { %s4371_s24 = sld [smem:[#allocation6_spill]] }
 0xf92   : > { %p3366_p4 = scmp.ge.s32.totalorder %s4370_s3, 2 }
 0xf93   : > { %s2813_s5 = sand.u32 1, %s4371_s24  }
 0xf94   : > { %p3363_p7 = pnand %p3366_p4, %p3725_p6  ;;  %s2814_s7 = scalar_lea.sflag [#allocation4], %s2813_s5 }
 0xf96   : > { %p3364_p8 = pneg %p3363_p7 }
 0xf98   : > { %3539 = dma.done.wait (%p3364_p8), %s2814_s7, 16  }
 0xf99   : > { %3541 = vsyncadd (%p3364_p8), %s2814_s7, 4294967280  ;;  %s4373_s1 = sld [smem:[#allocation10_spill]]  ;;  %s4376_s24 = smov %s3548_s25 }
 0xf9a   : > { %s4374_s9 = sld [smem:[#allocation7_spill]] }
 0xf9b   : > { %s4375_s5 = sld [smem:[#allocation11_spill]] }
 0xf9f   : > { %p35_p9 = scmp.ge.s32.totalorder %s4373_s1, 4  }
 0xfa0   : > { %s4377_s25 = smov %s4374_s9 }
 0xfa1   :  { %37 = sbr.rel (!%p35_p9) target bundleno = 17 (0x11), region = 163 }
 0xfa6   :  { %2819 = vsyncpa [#allocation4], 1 }
 0xfa7   :  { %2821 = vsyncpa [#allocation4 + $0x1], 1 }

</bundles_post_ra>
